<compile_context>
chip_gen: v6e
topology: v6e:2x2x1
jax: 0.10.0
libtpu: 0.0.40
codegen_flags: <defaults>
</compile_context>

<pallas_src>
import numpy as np
import jax
import jax.numpy as jnp
from jax.experimental import pallas as pl
from jax.experimental.pallas import tpu as pltpu

# ---------------- module hyper-parameters (from __init__) ----------------
SAMPLE_RATE = 22050
N_FFT = 1024
HOP_LENGTH = 256
WIN_LENGTH = 1024
N_MELS = 80
F_MIN = 80.0
F_MAX = 7600.0
EPS = 1e-10

N_FREQ = N_FFT // 2 + 1          # 513 onesided bins
N_FREQ_KEPT = 384                # bins 353..512 have exactly zero mel weight (f >= f_max)
N_MELS_PAD = 128                 # lane-dense output slab (zero-padded, exact)
MAX_ROW_TILE = 512               # amortizes per-step overhead; ~10 MiB VMEM footprint
FRAMES_PER_FFT = N_FFT // HOP_LENGTH   # 4 (exact)


# ---------------- deterministic parameter construction ----------------
def _hz_to_mel(freq):
    freq = np.asarray(freq, dtype=np.float64)
    f_sp = 200.0 / 3
    mels = freq / f_sp
    min_log_hz = 1000.0
    min_log_mel = min_log_hz / f_sp
    logstep = np.log(6.4) / 27.0
    return np.where(freq >= min_log_hz,
                    min_log_mel + np.log(np.maximum(freq, 1e-12) / min_log_hz) / logstep,
                    mels)


def _mel_to_hz(mels):
    mels = np.asarray(mels, dtype=np.float64)
    f_sp = 200.0 / 3
    freqs = f_sp * mels
    min_log_hz = 1000.0
    min_log_mel = min_log_hz / f_sp
    logstep = np.log(6.4) / 27.0
    return np.where(mels >= min_log_mel,
                    min_log_hz * np.exp(logstep * (mels - min_log_mel)),
                    freqs)


def make_mel_basis(sr, n_fft, n_mels, fmin, fmax):
    """librosa.filters.mel(sr, n_fft, n_mels, fmin, fmax) (slaney mels, slaney norm)."""
    fftfreqs = np.linspace(0.0, sr / 2.0, n_fft // 2 + 1)
    mel_pts = np.linspace(_hz_to_mel(fmin), _hz_to_mel(fmax), n_mels + 2)
    mel_f = _mel_to_hz(mel_pts)
    fdiff = np.diff(mel_f)
    ramps = mel_f[:, None] - fftfreqs[None, :]
    lower = -ramps[:-2] / fdiff[:-1, None]
    upper = ramps[2:] / fdiff[1:, None]
    weights = np.maximum(0.0, np.minimum(lower, upper))
    enorm = 2.0 / (mel_f[2:n_mels + 2] - mel_f[:n_mels])
    weights *= enorm[:, None]
    return weights.astype(np.float32)  # (n_mels, n_freq)


def make_hann_window(win_length):
    """torch.hann_window(win_length) -- periodic Hann."""
    n = np.arange(win_length, dtype=np.float64)
    return (0.5 - 0.5 * np.cos(2.0 * np.pi * n / win_length)).astype(np.float32)


def make_windowed_dft_basis():
    """Hann-window folded into the onesided DFT bases, cos|sin concatenated.

    Returns (N_FFT, 2 * N_FREQ_KEPT) float32:  [ w*cos | w*(-sin) ], with the frequency
    axis truncated to the first N_FREQ_KEPT bins (all dropped bins carry zero mel
    weight, so the truncation is exact for the final log-mel output).
    """
    window = make_hann_window(WIN_LENGTH)                      # (1024,)
    n = np.arange(N_FFT, dtype=np.float64)[:, None]
    k = np.arange(N_FREQ_KEPT, dtype=np.float64)[None, :]
    ang = 2.0 * np.pi * n * k / N_FFT
    cos_b = np.cos(ang) * window[:, None]
    sin_b = -np.sin(ang) * window[:, None]
    return np.concatenate([cos_b, sin_b], axis=1).astype(np.float32)  # (1024, 768)


def make_mel_basis_truncated():
    """mel_basis.T truncated to (N_FREQ_KEPT, N_MELS_PAD); asserts truncation is exact."""
    mb = make_mel_basis(SAMPLE_RATE, N_FFT, N_MELS, F_MIN, F_MAX)   # (80, 513)
    assert np.all(mb[:, N_FREQ_KEPT:] == 0.0), "frequency truncation would drop nonzero mel weights"
    out = np.zeros((N_FREQ_KEPT, N_MELS_PAD), dtype=np.float32)
    out[:, :N_MELS] = mb[:, :N_FREQ_KEPT].T
    return out


# ---------------- Pallas kernel ----------------
def mel_kernel(frames_ref, dft_ref, melb_ref, out_ref):
    # frames_ref: (row_tile, N_FFT) bf16 ; dft_ref: (N_FFT, 2*N_FREQ_KEPT) bf16
    # melb_ref:  (N_FREQ_KEPT, N_MELS_PAD) f32 ; out_ref: (row_tile, N_MELS_PAD) f32
    reim = jnp.dot(frames_ref[...], dft_ref[...],
                   preferred_element_type=jnp.float32)          # (rt, 768) f32 (MXU)
    re = reim[:, :N_FREQ_KEPT]                                  # clean 128-lane split
    im = reim[:, N_FREQ_KEPT:]
    mag = jnp.sqrt(re * re + im * im)                           # (rt, 384) f32 (VPU/EUP)
    mel = jnp.dot(mag, melb_ref[...],
                  preferred_element_type=jnp.float32)           # (rt, 128) f32 (small, f32 MXU)
    out_ref[...] = jnp.log10(jnp.maximum(mel, EPS))             # clamp(eps).log10()


def _choose_row_tile(rows):
    """Small inputs: one right-sized grid step (no forced grid>=2 on 1-TC chips).
    Large inputs: big 512/256/128-row steps, picked to minimize padded rows."""
    if rows <= MAX_ROW_TILE:
        return max(8, 8 * (-(-rows // 8)))
    best_tile, best_waste = None, None
    for t in (512, 256, 128):
        waste = (-rows) % t
        if best_waste is None or waste < best_waste:
            best_tile, best_waste = t, waste
    return best_tile


def mel_pallas(frames_2d, dft_basis, mel_basis_trunc, row_tile):
    rows = frames_2d.shape[0]                  # multiple of row_tile
    grid = (rows // row_tile,)
    flops = rows * (2 * N_FFT * 2 * N_FREQ_KEPT + 2 * N_FREQ_KEPT * N_MELS_PAD)
    bytes_accessed = (frames_2d.size * 2 + dft_basis.size * 2 +
                      mel_basis_trunc.size * 4 + rows * N_MELS_PAD * 4)
    return pl.pallas_call(
        mel_kernel,
        out_shape=jax.ShapeDtypeStruct((rows, N_MELS_PAD), jnp.float32),
        grid_spec=pltpu.PrefetchScalarGridSpec(
            num_scalar_prefetch=0,
            grid=grid,
            in_specs=[
                pl.BlockSpec((row_tile, N_FFT), lambda i: (i, 0)),
                pl.BlockSpec((N_FFT, 2 * N_FREQ_KEPT), lambda i: (0, 0)),
                pl.BlockSpec((N_FREQ_KEPT, N_MELS_PAD), lambda i: (0, 0)),
            ],
            out_specs=pl.BlockSpec((row_tile, N_MELS_PAD), lambda i: (i, 0)),
        ),
        compiler_params=pltpu.CompilerParams(
            dimension_semantics=("parallel",),
            vmem_limit_bytes=32 << 20,   # ~10 MiB actual footprint; safe on v7x (64 MiB)
        ),
        cost_estimate=pl.CostEstimate(
            flops=flops,
            transcendentals=rows * (N_MELS_PAD + N_FREQ_KEPT),
            bytes_accessed=bytes_accessed,
        ),
    )(frames_2d, dft_basis, mel_basis_trunc)


# ---------------- full forward (glue + kernel) ----------------
def mel_spectrogram_fixed(x, dft_basis, mel_basis_trunc):
    """x: (B, L) float32 waveform  ->  (B, n_mels, n_frames-1) float32."""
    B, L = x.shape
    pad = N_FFT // 2
    # torch.stft(center=True, pad_mode='reflect'); cast to bf16 after padding (halves
    # the frames slab's HBM bytes, matches the bf16 MXU path inside the kernel).
    x_pad = jnp.pad(x, ((0, 0), (pad, pad)), mode="reflect").astype(jnp.bfloat16)
    n_frames = 1 + (L + 2 * pad - N_FFT) // HOP_LENGTH

    # Framing without a gather: N_FFT == 4 * HOP, so reshape into hop-chunks and build
    # each frame as 4 consecutive chunks (4 shifted slices + one concat).
    n_chunks = n_frames + FRAMES_PER_FFT - 1
    chunks = x_pad[:, :n_chunks * HOP_LENGTH].reshape(B, n_chunks, HOP_LENGTH)
    frames = jnp.concatenate(
        [chunks[:, i:i + n_frames] for i in range(FRAMES_PER_FFT)], axis=-1)  # (B,T,1024)
    frames_2d = frames.reshape(B * n_frames, N_FFT)

    rows = B * n_frames
    row_tile = _choose_row_tile(rows)
    rows_pad = pl.cdiv(rows, row_tile) * row_tile
    if rows_pad != rows:
        frames_2d = jnp.pad(frames_2d, ((0, rows_pad - rows), (0, 0)))

    out = mel_pallas(frames_2d, dft_basis, mel_basis_trunc, row_tile)  # (rows_pad, 128)
    out = out[:rows, :N_MELS].reshape(B, n_frames, N_MELS)
    # matmul(spc.T, mel_basis).clamp(eps).log10().transpose(-1,-2)[..., :-1]
    return jnp.transpose(out, (0, 2, 1))[..., :-1]


if __name__ == "__main__":
    key = jax.random.PRNGKey(0)
    B, L = 2, 2048  # small waveform; n_frames = L//hop + 1 = 9 -> output T = 8
    x = jax.random.normal(key, (B, L), dtype=jnp.float32)

    dft_basis = jnp.asarray(make_windowed_dft_basis()).astype(jnp.bfloat16)   # (1024, 768)
    mel_basis_trunc = jnp.asarray(make_mel_basis_truncated())                 # (384, 128) f32

    y = jax.jit(mel_spectrogram_fixed)(x, dft_basis, mel_basis_trunc)
    y = jax.block_until_ready(y)

    assert y.shape == (B, N_MELS, L // HOP_LENGTH), y.shape
    assert y.dtype == jnp.float32
    assert bool(jnp.all(jnp.isfinite(y)))
    print("KERNEL_OK")
</pallas_src>

<mosaic_0001>
module attributes {stable_mosaic.version = 11 : i64} {
  func.func @mel_kernel(%arg0: i32, %arg1: memref<24x1024xbf16, #tpu.memory_space<vmem>>, %arg2: memref<1024x768xbf16, #tpu.memory_space<vmem>>, %arg3: memref<384x128xf32, #tpu.memory_space<vmem>>, %arg4: memref<24x128xf32, #tpu.memory_space<vmem>>) attributes {dimension_semantics = [#tpu.dimension_semantics<parallel>], iteration_bounds = array<i64: 1>, scalar_prefetch = 0 : i64, scratch_operands = 0 : i64, tpu.core_type = #tpu.core_type<tc>, window_params = [{transform_indices = @transform_0, window_bounds = array<i64: 24, 1024>}, {pipeline_mode = #tpu.pipeline_mode<synchronous>, transform_indices = @transform_1, window_bounds = array<i64: 1024, 768>}, {pipeline_mode = #tpu.pipeline_mode<synchronous>, transform_indices = @transform_2, window_bounds = array<i64: 384, 128>}, {transform_indices = @transform_3, window_bounds = array<i64: 24, 128>}]} {
    %c0 = arith.constant 0 : index
    %c0_0 = arith.constant 0 : index
    %0 = vector.load %arg1[%c0, %c0_0] : memref<24x1024xbf16, #tpu.memory_space<vmem>>, vector<24x1024xbf16>
    %c0_1 = arith.constant 0 : index
    %c0_2 = arith.constant 0 : index
    %1 = vector.load %arg2[%c0_1, %c0_2] : memref<1024x768xbf16, #tpu.memory_space<vmem>>, vector<1024x768xbf16>
    %cst = arith.constant dense<0.000000e+00> : vector<24x768xf32>
    %2 = tpu.matmul %0, %1, %cst {dimension_numbers = #tpu.dot_dimension_numbers<[1], [0], [0], [1], [0, 0, 1, 1], [], []>} : vector<24x1024xbf16>, vector<1024x768xbf16>, vector<24x768xf32> -> vector<24x768xf32>
    %3 = vector.extract_strided_slice %2 {offsets = [0, 0], sizes = [24, 384], strides = [1, 1]} : vector<24x768xf32> to vector<24x384xf32>
    %4 = vector.extract_strided_slice %2 {offsets = [0, 384], sizes = [24, 384], strides = [1, 1]} : vector<24x768xf32> to vector<24x384xf32>
    %5 = arith.mulf %3, %3 : vector<24x384xf32>
    %6 = arith.mulf %4, %4 : vector<24x384xf32>
    %7 = arith.addf %5, %6 : vector<24x384xf32>
    %8 = math.sqrt %7 : vector<24x384xf32>
    %c0_3 = arith.constant 0 : index
    %c0_4 = arith.constant 0 : index
    %9 = vector.load %arg3[%c0_3, %c0_4] : memref<384x128xf32, #tpu.memory_space<vmem>>, vector<384x128xf32>
    %cst_5 = arith.constant dense<0.000000e+00> : vector<24x128xf32>
    %10 = tpu.matmul %8, %9, %cst_5 {dimension_numbers = #tpu.dot_dimension_numbers<[1], [0], [0], [1], [0, 0, 1, 1], [], []>} : vector<24x384xf32>, vector<384x128xf32>, vector<24x128xf32> -> vector<24x128xf32>
    %cst_6 = arith.constant 1.000000e-10 : f32
    %11 = vector.broadcast %cst_6 : f32 to vector<24x128xf32>
    %12 = arith.maximumf %10, %11 : vector<24x128xf32>
    %13 = math.log %12 : vector<24x128xf32>
    %cst_7 = arith.constant 0.434294492 : f32
    %14 = vector.broadcast %cst_7 : f32 to vector<24x128xf32>
    %15 = arith.mulf %13, %14 : vector<24x128xf32>
    %c0_8 = arith.constant 0 : index
    %c0_9 = arith.constant 0 : index
    %16 = vector.load %arg4[%c0_8, %c0_9] : memref<24x128xf32, #tpu.memory_space<vmem>>, vector<24x128xf32>
    tpu.vector_store %arg4[%c0_8, %c0_9], %15 {strides = array<i32>} : memref<24x128xf32, #tpu.memory_space<vmem>>, vector<24x128xf32>,
    return
  }
  func.func @transform_0(%arg0: i32) -> (i32, i32) {
    %c0_i32 = arith.constant 0 : i32
    %c0_i32_0 = arith.constant 0 : i32
    return %arg0, %c0_i32 : i32, i32
  }
  func.func @transform_1(%arg0: i32) -> (i32, i32) {
    %c0_i32 = arith.constant 0 : i32
    %c0_i32_0 = arith.constant 0 : i32
    %c0_i32_1 = arith.constant 0 : i32
    return %c0_i32, %c0_i32_0 : i32, i32
  }
  func.func @transform_2(%arg0: i32) -> (i32, i32) {
    %c0_i32 = arith.constant 0 : i32
    %c0_i32_0 = arith.constant 0 : i32
    %c0_i32_1 = arith.constant 0 : i32
    return %c0_i32, %c0_i32_0 : i32, i32
  }
  func.func @transform_3(%arg0: i32) -> (i32, i32) {
    %c0_i32 = arith.constant 0 : i32
    %c0_i32_0 = arith.constant 0 : i32
    return %arg0, %c0_i32 : i32, i32
  }
}

</mosaic_0001>

<bundles_post_ra>
// kernel: mel_spectrogram_fixed.1
= control target key start
LH: loop header
LB: loop body
LE: loop exit
PB: predicated region body
PF: predicated region fallthrough
CT: control target
= control target key end

     0   :  { %8 = vsyncpa [#allocation3], 0  ;;  %s4830_s0 = inlined_call_operand.vmem [shape: bf16[24,1024], index: 0, kind: input, shape index: {}]   ;;  %s4831_s1 = inlined_call_operand.hbm [shape: bf16[1024,768], index: 1, kind: input, shape index: {}]   ;;  %s4832_s2 = inlined_call_operand.hbm [shape: f32[384,128], index: 2, kind: input, shape index: {}]   ;;  %s4833_s3 = inlined_call_operand.vmem [shape: f32[24,128], index: 3, kind: output, shape index: {}]  }
   0x1   :  { %9 = vsyncpa [#allocation5], 0  ;;  %s4518_s12 = smov [#allocation2]  }
   0x2   :  { %s17_s13 = sshll.u32 %s4518_s12, 4  ;;  %s18_s13 = int_to_ptr.vmem [resolvable:$true] %s17_s13 }
   0x3   :  { %s4482_s14 = scalar_lea.vmem %s18_s13, 49152  ;;  %p4487_p1 = scmp.lt.s32.totalorder %s18_s13, %s18_s13 }
   0x4   :  { %p4483_p0 = scmp.ne.s32.totalorder %s18_s13, %s4482_s14  ;;  %p4488_p2 = scmp.lt.s32.totalorder %s4482_s14, %s4482_s14 }
   0x6   :  { %p4489_p3 = por %p4488_p2, %p4487_p1 }
   0x8   :  { %p4490_p4 = pnand %p4489_p3, %p4483_p0 }
   0xa   :  { %4493 = shalt.err (!%p4490_p4)
}
   0xb   :  { %s4519_s15 = smov 384   ;;  %s4520_s16 = smov 24  }
   0xc   :  { %23 = dma.hbm_to_vmem [thread:$0]  %s4831_s1, 49152, %s18_s13, [#allocation3], %s4519_s15, %s4519_s15, %s4520_s16  }
   0xd   :  { %s4521_s19 = smov [#allocation4]  }
   0xe   :  { %s29_s20 = sshll.u32 %s4521_s19, 4  ;;  %s30_s20 = int_to_ptr.vmem [resolvable:$true] %s29_s20 }
   0xf   :  { %s4502_s21 = scalar_lea.vmem %s30_s20, 6144  ;;  %p4507_p6 = scmp.lt.s32.totalorder %s30_s20, %s30_s20 }
  0x10   :  { %p4503_p5 = scmp.ne.s32.totalorder %s30_s20, %s4502_s21  ;;  %p4508_p7 = scmp.lt.s32.totalorder %s4502_s21, %s4502_s21 }
  0x12   :  { %p4509_p8 = por %p4508_p7, %p4507_p6 }
  0x14   :  { %p4510_p9 = pnand %p4509_p8, %p4503_p5 }
  0x16   :  { %4513 = shalt.err (!%p4510_p9)
}
  0x17   :  { %s4522_s22 = smov 128   ;;  %s4523_s23 = smov 8  }
  0x18   :  { %35 = dma.hbm_to_vmem [thread:$0]  %s4832_s2, 6144, %s30_s20, [#allocation5], %s4522_s22, %s4522_s22, %s4523_s23  }
  0x19   :  { %4514 = dma.done.wait [#allocation3], 49152  }
  0x1a   :  { %4515 = vsyncadd [#allocation3], 4294918144 }
  0x1b   :  { %4516 = dma.done.wait [#allocation5], 6144  }
  0x1c   :  { %4517 = vsyncadd [#allocation5], 4294961152  ;;  %v3866_v0 = vld [vmem:[#allocation2 + $0x154] ss:$24 sps:$4 sm:$0xff]   ;;  %v3870_v2 = vld [vmem:[#allocation2 + $0x150] ss:$24 sps:$4 sm:$0xff]  }
  0x1d   :  { %v3868_v1 = vld [vmem:[#allocation2 + $0x454] ss:$24 sps:$4 sm:$0xff]   ;;  %2426 = vmatprep.subr.bf16.mxu0 %v3866_v0  ;;  %v3871_v3 = vld [vmem:[#allocation2 + $0x450] ss:$24 sps:$4 sm:$0xff]   ;;  %v3872_v4 = vld [vmem:[#allocation2 + $0x124] ss:$24 sps:$4 sm:$0xff]  }
  0x1e   :  { %2477 = vmatprep.subr.bf16.mxu1 %v3868_v1  ;;  %2427 = vmatpush1.bf16.msra.mxu0 %v3870_v2  ;;  %v3874_v5 = vld [vmem:[#allocation2 + $0x424] ss:$24 sps:$4 sm:$0xff]   ;;  %v3876_v6 = vld [vmem:[#allocation2 + $0x120] ss:$24 sps:$4 sm:$0xff]   ;;  %v3878_v8 = vld [vmem:[#allocation2 + $0xf4] ss:$24 sps:$4 sm:$0xff]  }
  0x1f   :  { %2478 = vmatpush1.bf16.msra.mxu1 %v3871_v3  ;;  %2428 = vmatprep.subr.bf16.mxu0 %v3872_v4  ;;  %v3877_v7 = vld [vmem:[#allocation2 + $0x420] ss:$24 sps:$4 sm:$0xff]   ;;  %v3880_v9 = vld [vmem:[#allocation2 + $0x3f4] ss:$24 sps:$4 sm:$0xff]   ;;  %v3882_v10 = vld [vmem:[#allocation2 + $0xf0] ss:$24 sps:$4 sm:$0xff]  }
  0x20   :  { %2479 = vmatprep.subr.bf16.mxu1 %v3874_v5  ;;  %v3883_v11 = vld [vmem:[#allocation2 + $0x3f0] ss:$24 sps:$4 sm:$0xff]   ;;  %v3884_v12 = vld [vmem:[#allocation2 + $0xc4] ss:$24 sps:$4 sm:$0xff]   ;;  %v3888_v14 = vld [vmem:[#allocation2 + $0xc0] ss:$24 sps:$4 sm:$0xff]  }
  0x21   :  { %v3886_v13 = vld [vmem:[#allocation2 + $0x3c4] ss:$24 sps:$4 sm:$0xff]   ;;  %v3889_v15 = vld [vmem:[#allocation2 + $0x3c0] ss:$24 sps:$4 sm:$0xff]   ;;  %v3890_v16 = vld [vmem:[#allocation2 + $0x94] ss:$24 sps:$4 sm:$0xff]  }
  0x22   :  { %2429 = vmatpush1.bf16.msra.mxu0 %v3876_v6  ;;  %v3892_v17 = vld [vmem:[#allocation2 + $0x394] ss:$24 sps:$4 sm:$0xff]   ;;  %v3894_v18 = vld [vmem:[#allocation2 + $0x90] ss:$24 sps:$4 sm:$0xff]   ;;  %v3896_v20 = vld [vmem:[#allocation2 + $0x64] ss:$24 sps:$4 sm:$0xff]  }
  0x23   :  { %2480 = vmatpush1.bf16.msra.mxu1 %v3877_v7  ;;  %2430 = vmatprep.subr.bf16.mxu0 %v3878_v8  ;;  %v3895_v19 = vld [vmem:[#allocation2 + $0x390] ss:$24 sps:$4 sm:$0xff]   ;;  %v3898_v21 = vld [vmem:[#allocation2 + $0x364] ss:$24 sps:$4 sm:$0xff]   ;;  %v3900_v22 = vld [vmem:[#allocation2 + $0x60] ss:$24 sps:$4 sm:$0xff]  }
  0x24   :  { %2481 = vmatprep.subr.bf16.mxu1 %v3880_v9  ;;  %v3901_v23 = vld [vmem:[#allocation2 + $0x360] ss:$24 sps:$4 sm:$0xff]   ;;  %v3902_v24 = vld [vmem:[#allocation2 + $0x34] ss:$24 sps:$4 sm:$0xff]   ;;  %v3906_v26 = vld [vmem:[#allocation2 + $0x30] ss:$24 sps:$4 sm:$0xff]  }
  0x25   :  { %v3904_v25 = vld [vmem:[#allocation2 + $0x334] ss:$24 sps:$4 sm:$0xff]   ;;  %v3907_v27 = vld [vmem:[#allocation2 + $0x330] ss:$24 sps:$4 sm:$0xff]   ;;  %v3908_v28 = vld [vmem:[#allocation2 + $0x4] ss:$24 sps:$4 sm:$0xff]  }
  0x26   :  { %2431 = vmatpush1.bf16.msra.mxu0 %v3882_v10  ;;  %v3910_v29 = vld [vmem:[#allocation2 + $0x304] ss:$24 sps:$4 sm:$0xff]   ;;  %v3912_v30 = vld [vmem:[#allocation2] ss:$24 sps:$4 sm:$0xff]   ;;  %v3914_v32 = vld [vmem:[#allocation2 + $0x2d4] ss:$24 sps:$4 sm:$0xff]  }
  0x27   :  { %2482 = vmatpush1.bf16.msra.mxu1 %v3883_v11  ;;  %2432 = vmatprep.subr.bf16.mxu0 %v3884_v12  ;;  %v3913_v31 = vld [vmem:[#allocation2 + $0x300] ss:$24 sps:$4 sm:$0xff]   ;;  %v3916_v33 = vld [vmem:[#allocation2 + $0x5d4] ss:$24 sps:$4 sm:$0xff]   ;;  %v3918_v34 = vld [vmem:[#allocation2 + $0x2d0] ss:$24 sps:$4 sm:$0xff]  }
  0x28   :  { %2483 = vmatprep.subr.bf16.mxu1 %v3886_v13  ;;  %v3919_v35 = vld [vmem:[#allocation2 + $0x5d0] ss:$24 sps:$4 sm:$0xff]   ;;  %v3920_v36 = vld [vmem:[#allocation2 + $0x2a4] ss:$24 sps:$4 sm:$0xff]   ;;  %v3924_v38 = vld [vmem:[#allocation2 + $0x2a0] ss:$24 sps:$4 sm:$0xff]  }
  0x29   :  { %v3922_v37 = vld [vmem:[#allocation2 + $0x5a4] ss:$24 sps:$4 sm:$0xff]   ;;  %v3925_v39 = vld [vmem:[#allocation2 + $0x5a0] ss:$24 sps:$4 sm:$0xff]   ;;  %v3926_v40 = vld [vmem:[#allocation2 + $0x274] ss:$24 sps:$4 sm:$0xff]  }
  0x2a   :  { %2433 = vmatpush1.bf16.msra.mxu0 %v3888_v14  ;;  %v3928_v41 = vld [vmem:[#allocation2 + $0x574] ss:$24 sps:$4 sm:$0xff]   ;;  %v3930_v42 = vld [vmem:[#allocation2 + $0x270] ss:$24 sps:$4 sm:$0xff]   ;;  %v3932_v44 = vld [vmem:[#allocation2 + $0x244] ss:$24 sps:$4 sm:$0xff]  }
  0x2b   :  { %2484 = vmatpush1.bf16.msra.mxu1 %v3889_v15  ;;  %2434 = vmatprep.subr.bf16.mxu0 %v3890_v16  ;;  %v3931_v43 = vld [vmem:[#allocation2 + $0x570] ss:$24 sps:$4 sm:$0xff]   ;;  %v3934_v45 = vld [vmem:[#allocation2 + $0x544] ss:$24 sps:$4 sm:$0xff]   ;;  %v3936_v46 = vld [vmem:[#allocation2 + $0x240] ss:$24 sps:$4 sm:$0xff]  }
  0x2c   :  { %2485 = vmatprep.subr.bf16.mxu1 %v3892_v17  ;;  %v3937_v47 = vld [vmem:[#allocation2 + $0x540] ss:$24 sps:$4 sm:$0xff]   ;;  %v43_v50 = vld [vmem:[%s4830_s0 + $0x8] sm:$0xff]  ;;  %v3944_v58 = vld [vmem:[#allocation2 + $0x1e4] ss:$24 sps:$4 sm:$0xff]   ;;  %vm4525_vm0 = vmmov 0  }
  0x2d   :  { %v42_v48 = vld [vmem:[%s4830_s0] sm:$0xff]  ;;  %v47_v51 = vld [vmem:[%s4830_s0 + $0x28] sm:$0xff] }
  0x2e   :  { %2435 = vmatpush1.bf16.msra.mxu0 %v3894_v18  ;;  %v46_v49 = vld [vmem:[%s4830_s0 + $0x20] sm:$0xff]  ;;  %v3938_v52 = vld [vmem:[#allocation2 + $0x214] ss:$24 sps:$4 sm:$0xff]   ;;  %v4566_v54 = vcombine.high %v43_v50, %v47_v51  ;;  %v3942_v56 = vld [vmem:[#allocation2 + $0x210] ss:$24 sps:$4 sm:$0xff]   ;;  %v4572_v9 = vcombine.low %v43_v50, %v47_v51 }
  0x2f   :  { %2486 = vmatpush1.bf16.msra.mxu1 %v3895_v19  ;;  %2436 = vmatprep.subr.bf16.mxu0 %v3896_v20  ;;  %v4564_v53 = vcombine.high %v42_v48, %v46_v49  ;;  %v3940_v55 = vld [vmem:[#allocation2 + $0x514] ss:$24 sps:$4 sm:$0xff]   ;;  %v3943_v57 = vld [vmem:[#allocation2 + $0x510] ss:$24 sps:$4 sm:$0xff]   ;;  %v3946_v59 = vld [vmem:[#allocation2 + $0x4e4] ss:$24 sps:$4 sm:$0xff]   ;;  %v4570_v8 = vcombine.low %v42_v48, %v46_v49 }
  0x30   :  { %2487 = vmatprep.subr.bf16.mxu1 %v3898_v21  ;;  %2509 = vmatprep.mubr.bf16.mxu1 %v4566_v54  ;;  %v3948_v60 = vld [vmem:[#allocation2 + $0x1e0] ss:$24 sps:$4 sm:$0xff]   ;;  %v3950_v62 = vld [vmem:[#allocation2 + $0x1b4] ss:$24 sps:$4 sm:$0xff]   ;;  %v3954_v0 = vld [vmem:[#allocation2 + $0x1b0] ss:$24 sps:$4 sm:$0xff]  }
  0x31   :  { %2458 = vmatprep.mubr.bf16.mxu0 %v4564_v53  ;;  %v3949_v61 = vld [vmem:[#allocation2 + $0x4e0] ss:$24 sps:$4 sm:$0xff]   ;;  %v3952_v63 = vld [vmem:[#allocation2 + $0x4b4] ss:$24 sps:$4 sm:$0xff]   ;;  %v3955_v1 = vld [vmem:[#allocation2 + $0x4b0] ss:$24 sps:$4 sm:$0xff]  }
  0x32   :  { %2437 = vmatpush1.bf16.msra.mxu0 %v3900_v22  ;;  %v3956_v2 = vld [vmem:[#allocation2 + $0x184] ss:$24 sps:$4 sm:$0xff]   ;;  %v3960_v4 = vld [vmem:[#allocation2 + $0x180] ss:$24 sps:$4 sm:$0xff]   ;;  %v3964_v6 = vld [vmem:[#allocation2 + $0x754] ss:$24 sps:$4 sm:$0xff]  }
  0x33   :  { %2488 = vmatpush1.bf16.msra.mxu1 %v3901_v23  ;;  %2438 = vmatprep.subr.bf16.mxu0 %v3902_v24  ;;  %v3958_v3 = vld [vmem:[#allocation2 + $0x484] ss:$24 sps:$4 sm:$0xff]   ;;  %v3961_v5 = vld [vmem:[#allocation2 + $0x480] ss:$24 sps:$4 sm:$0xff]   ;;  %v3967_v7 = vld [vmem:[#allocation2 + $0xa54] ss:$24 sps:$4 sm:$0xff]  }
  0x34   :  { %2489 = vmatprep.subr.bf16.mxu1 %v3904_v25  ;;  %v3962_v10 = vld [vmem:[#allocation2 + $0x750] ss:$24 sps:$4 sm:$0xff]   ;;  %v3970_v12 = vld [vmem:[#allocation2 + $0x724] ss:$24 sps:$4 sm:$0xff]   ;;  %v3968_v14 = vld [vmem:[#allocation2 + $0x720] ss:$24 sps:$4 sm:$0xff]  }
  0x35   :  { %v3965_v11 = vld [vmem:[#allocation2 + $0xa50] ss:$24 sps:$4 sm:$0xff]   ;;  %v3973_v13 = vld [vmem:[#allocation2 + $0xa24] ss:$24 sps:$4 sm:$0xff]   ;;  %v3971_v15 = vld [vmem:[#allocation2 + $0xa20] ss:$24 sps:$4 sm:$0xff]  }
  0x36   :  { %2439 = vmatpush1.bf16.msra.mxu0 %v3906_v26  ;;  %v3976_v16 = vld [vmem:[#allocation2 + $0x6f4] ss:$24 sps:$4 sm:$0xff]   ;;  %v3974_v18 = vld [vmem:[#allocation2 + $0x6f0] ss:$24 sps:$4 sm:$0xff]   ;;  %v3982_v20 = vld [vmem:[#allocation2 + $0x6c4] ss:$24 sps:$4 sm:$0xff]  }
  0x37   :  { %2490 = vmatpush1.bf16.msra.mxu1 %v3907_v27  ;;  %2440 = vmatprep.subr.bf16.mxu0 %v3908_v28  ;;  %v3979_v17 = vld [vmem:[#allocation2 + $0x9f4] ss:$24 sps:$4 sm:$0xff]   ;;  %v3977_v19 = vld [vmem:[#allocation2 + $0x9f0] ss:$24 sps:$4 sm:$0xff]   ;;  %v3985_v21 = vld [vmem:[#allocation2 + $0x9c4] ss:$24 sps:$4 sm:$0xff]  }
  0x38   :  { %2491 = vmatprep.subr.bf16.mxu1 %v3910_v29  ;;  %v3980_v22 = vld [vmem:[#allocation2 + $0x6c0] ss:$24 sps:$4 sm:$0xff]   ;;  %v3988_v24 = vld [vmem:[#allocation2 + $0x694] ss:$24 sps:$4 sm:$0xff]   ;;  %v4009_v48 = vld [vmem:[#allocation2 + $0x904] ss:$24 sps:$4 sm:$0xff]  }
  0x39   :  { %v3983_v23 = vld [vmem:[#allocation2 + $0x9c0] ss:$24 sps:$4 sm:$0xff]   ;;  %v3991_v25 = vld [vmem:[#allocation2 + $0x994] ss:$24 sps:$4 sm:$0xff]  }
  0x3a   :  { %2441 = vmatpush1.bf16.msra.mxu0 %v3912_v30  ;;  %v50_v26 = vld [vmem:[%s4830_s0 + $0x40] sm:$0xff]  ;;  %v51_v29 = vld [vmem:[%s4830_s0 + $0x48] sm:$0xff] }
  0x3b   :  { %2492 = vmatpush1.bf16.msra.mxu1 %v3913_v31  ;;  %2442 = vmatprep.subr.bf16.mxu0 %v3914_v32  ;;  %v4579_v27 = vcombine.high %v50_v26, %v50_v26  ;;  %v4581_v28 = vcombine.low %v50_v26, %v50_v26  ;;  %v3986_v30 = vld [vmem:[#allocation2 + $0x690] ss:$24 sps:$4 sm:$0xff]   ;;  %v4586_v32 = vcombine.high %v51_v29, %v51_v29  ;;  %v4004_v50 = vld [vmem:[#allocation2 + $0x600] ss:$24 sps:$4 sm:$0xff]  }
  0x3c   :  { %2493 = vmatprep.subr.bf16.mxu1 %v3916_v33  ;;  %v3989_v31 = vld [vmem:[#allocation2 + $0x990] ss:$24 sps:$4 sm:$0xff]   ;;  %v4588_v33 = vcombine.low %v51_v29, %v51_v29  ;;  %v4007_v51 = vld [vmem:[#allocation2 + $0x900] ss:$24 sps:$4 sm:$0xff]  }
  0x3d   :  { %v4062_v26 = vld [vmem:[#allocation2 + $0x158] ss:$24 sps:$4 sm:$0xff]  }
  0x3e   :  { %2443 = vmatpush2.bf16.msra.mxu0 %v3918_v34  ;;  %v3994_v34 = vld [vmem:[#allocation2 + $0x664] ss:$24 sps:$4 sm:$0xff]   ;;  %v4065_v29 = vld [vmem:[#allocation2 + $0x458] ss:$24 sps:$4 sm:$0xff]  }
  0x3f   :  { %2494 = vmatpush2.bf16.msra.mxu1 %v3919_v35  ;;  %2444 = vmatprep.subr.bf16.mxu0 %v3920_v36  ;;  %v3997_v35 = vld [vmem:[#allocation2 + $0x964] ss:$24 sps:$4 sm:$0xff]   ;;  %v3992_v36 = vld [vmem:[#allocation2 + $0x660] ss:$24 sps:$4 sm:$0xff]  }
  0x40   :  { %2495 = vmatprep.subr.bf16.mxu1 %v3922_v37  ;;  %v3995_v37 = vld [vmem:[#allocation2 + $0x960] ss:$24 sps:$4 sm:$0xff]  }
  0x42   :  { %2445 = vmatpush2.bf16.msra.mxu0 %v3924_v38  ;;  %v4000_v38 = vld [vmem:[#allocation2 + $0x634] ss:$24 sps:$4 sm:$0xff]  }
  0x43   :  { %2496 = vmatpush2.bf16.msra.mxu1 %v3925_v39  ;;  %2446 = vmatprep.subr.bf16.mxu0 %v3926_v40  ;;  %v4003_v39 = vld [vmem:[#allocation2 + $0x934] ss:$24 sps:$4 sm:$0xff]   ;;  %v3998_v40 = vld [vmem:[#allocation2 + $0x630] ss:$24 sps:$4 sm:$0xff]  }
  0x44   :  { %2497 = vmatprep.subr.bf16.mxu1 %v3928_v41  ;;  %v4001_v41 = vld [vmem:[#allocation2 + $0x930] ss:$24 sps:$4 sm:$0xff]  }
  0x46   :  { %2447 = vmatpush2.bf16.msra.mxu0 %v3930_v42  ;;  %v4597_v42 = vld [vmem:[%s4830_s0 + $0x10] sm:$0xff] }
  0x47   :  { %2498 = vmatpush2.bf16.msra.mxu1 %v3931_v43  ;;  %2448 = vmatprep.subr.bf16.mxu0 %v3932_v44  ;;  %v4602_v43 = vld [vmem:[%s4830_s0 + $0x30] sm:$0xff] }
  0x48   :  { %2499 = vmatprep.subr.bf16.mxu1 %v3934_v45  ;;  %v4606_v44 = vcombine.high %v4597_v42, %v4602_v43  ;;  %v4611_v45 = vld [vmem:[%s4830_s0 + $0x18] sm:$0xff] }
  0x4a   :  { %2449 = vmatpush2.bf16.msra.mxu0 %v3936_v46  ;;  %v4616_v46 = vld [vmem:[%s4830_s0 + $0x38] sm:$0xff] }
  0x4b   :  { %2500 = vmatpush2.bf16.msra.mxu1 %v3937_v47  ;;  %2450 = vmatprep.subr.bf16.mxu0 %v3938_v52  ;;  %v4006_v47 = vld [vmem:[#allocation2 + $0x604] ss:$24 sps:$4 sm:$0xff]   ;;  %v4620_v49 = vcombine.high %v4611_v45, %v4616_v46  ;;  %v4012_v52 = vld [vmem:[#allocation2 + $0x8d4] ss:$24 sps:$4 sm:$0xff]  }
  0x4c   :  { %2501 = vmatprep.subr.bf16.mxu1 %v3940_v55  ;;  %v4015_v55 = vld [vmem:[#allocation2 + $0xbd4] ss:$24 sps:$4 sm:$0xff]  }
  0x4e   :  { %2451 = vmatpush2.bf16.msra.mxu0 %v3942_v56  ;;  %v4010_v56 = vld [vmem:[#allocation2 + $0x8d0] ss:$24 sps:$4 sm:$0xff]  }
  0x4f   :  { %2502 = vmatpush2.bf16.msra.mxu1 %v3943_v57  ;;  %2452 = vmatprep.subr.bf16.mxu0 %v3944_v58  ;;  %v4013_v57 = vld [vmem:[#allocation2 + $0xbd0] ss:$24 sps:$4 sm:$0xff]   ;;  %v4018_v58 = vld [vmem:[#allocation2 + $0x8a4] ss:$24 sps:$4 sm:$0xff]  }
  0x50   :  { %2503 = vmatprep.subr.bf16.mxu1 %v3946_v59  ;;  %v4021_v59 = vld [vmem:[#allocation2 + $0xba4] ss:$24 sps:$4 sm:$0xff]  }
  0x52   :  { %2453 = vmatpush2.bf16.msra.mxu0 %v3948_v60  ;;  %v4016_v60 = vld [vmem:[#allocation2 + $0x8a0] ss:$24 sps:$4 sm:$0xff]  }
  0x53   :  { %2504 = vmatpush2.bf16.msra.mxu1 %v3949_v61  ;;  %2454 = vmatprep.subr.bf16.mxu0 %v3950_v62  ;;  %v4019_v61 = vld [vmem:[#allocation2 + $0xba0] ss:$24 sps:$4 sm:$0xff]   ;;  %v4024_v62 = vld [vmem:[#allocation2 + $0x874] ss:$24 sps:$4 sm:$0xff]  }
  0x54   :  { %2505 = vmatprep.subr.bf16.mxu1 %v3952_v63  ;;  %v4027_v63 = vld [vmem:[#allocation2 + $0xb74] ss:$24 sps:$4 sm:$0xff]  }
  0x56   :  { %2455 = vmatpush2.bf16.msra.mxu0 %v3954_v0  ;;  %v4022_v0 = vld [vmem:[#allocation2 + $0x870] ss:$24 sps:$4 sm:$0xff]  }
  0x57   :  { %2506 = vmatpush2.bf16.msra.mxu1 %v3955_v1  ;;  %2456 = vmatprep.subr.bf16.mxu0 %v3956_v2  ;;  %v4025_v1 = vld [vmem:[#allocation2 + $0xb70] ss:$24 sps:$4 sm:$0xff]   ;;  %v4030_v2 = vld [vmem:[#allocation2 + $0x844] ss:$24 sps:$4 sm:$0xff]  }
  0x58   :  { %2507 = vmatprep.subr.bf16.mxu1 %v3958_v3  ;;  %v4033_v3 = vld [vmem:[#allocation2 + $0xb44] ss:$24 sps:$4 sm:$0xff]  }
  0x5a   :  { %2457 = vmatpush2.bf16.msra.mxu0 %v3960_v4  ;;  %v4028_v4 = vld [vmem:[#allocation2 + $0x840] ss:$24 sps:$4 sm:$0xff]  }
  0x5b   :  { %2508 = vmatpush2.bf16.msra.mxu1 %v3961_v5  ;;  %2528 = vmatprep.subr.bf16.mxu0 %v3964_v6  ;;  %v4031_v5 = vld [vmem:[#allocation2 + $0xb40] ss:$24 sps:$4 sm:$0xff]   ;;  %v4036_v6 = vld [vmem:[#allocation2 + $0x814] ss:$24 sps:$4 sm:$0xff]  }
  0x5c   :  { %2579 = vmatprep.subr.bf16.mxu1 %v3967_v7  ;;  %v4039_v7 = vld [vmem:[#allocation2 + $0xb14] ss:$24 sps:$4 sm:$0xff]  }
  0x5d   :  { %2459 = vmatmul.mubr.bf16.vlgmr.msra.gmra.mxu0 %v4570_v8 }
  0x5e   :  { %2510 = vmatmul.mubr.bf16.vlgmr.msra.gmra.mxu1 %v4572_v9  ;;  %2529 = vmatpush1.bf16.msra.mxu0 %v3962_v10  ;;  %v4034_v10 = vld [vmem:[#allocation2 + $0x810] ss:$24 sps:$4 sm:$0xff]  }
  0x5f   :  { %2580 = vmatpush1.bf16.msra.mxu1 %v3965_v11  ;;  %2530 = vmatprep.subr.bf16.mxu0 %v3970_v12  ;;  %v4037_v11 = vld [vmem:[#allocation2 + $0xb10] ss:$24 sps:$4 sm:$0xff]   ;;  %v4045_v12 = vld [vmem:[#allocation2 + $0x7e4] ss:$24 sps:$4 sm:$0xff]  }
  0x60   :  { %2581 = vmatprep.subr.bf16.mxu1 %v3973_v13  ;;  %2468 = vmatprep.mubr.bf16.mxu0 %v4579_v27  ;;  %v4048_v13 = vld [vmem:[#allocation2 + $0xae4] ss:$24 sps:$4 sm:$0xff]  }
  0x61   :  { %2519 = vmatprep.mubr.bf16.mxu1 %v4586_v32 }
  0x62   :  { %2531 = vmatpush1.bf16.msra.mxu0 %v3968_v14  ;;  %v4043_v14 = vld [vmem:[#allocation2 + $0x7e0] ss:$24 sps:$4 sm:$0xff]  }
  0x63   :  { %2582 = vmatpush1.bf16.msra.mxu1 %v3971_v15  ;;  %2532 = vmatprep.subr.bf16.mxu0 %v3976_v16  ;;  %v4046_v15 = vld [vmem:[#allocation2 + $0xae0] ss:$24 sps:$4 sm:$0xff]   ;;  %v4052_v16 = vld [vmem:[#allocation2 + $0x7b4] ss:$24 sps:$4 sm:$0xff]  }
  0x64   :  { %2583 = vmatprep.subr.bf16.mxu1 %v3979_v17  ;;  %v4055_v17 = vld [vmem:[#allocation2 + $0xab4] ss:$24 sps:$4 sm:$0xff]  }
  0x65   :  { %2469 = vmatmul.mubr.bf16.gmra.mxu0 %v4581_v28 }
  0x66   :  { %2533 = vmatpush1.bf16.msra.mxu0 %v3974_v18  ;;  %2520 = vmatmul.mubr.bf16.gmra.mxu1 %v4588_v33  ;;  %v4050_v18 = vld [vmem:[#allocation2 + $0x7b0] ss:$24 sps:$4 sm:$0xff]  }
  0x67   :  { %2584 = vmatpush1.bf16.msra.mxu1 %v3977_v19  ;;  %2534 = vmatprep.subr.bf16.mxu0 %v3982_v20  ;;  %v4053_v19 = vld [vmem:[#allocation2 + $0xab0] ss:$24 sps:$4 sm:$0xff]   ;;  %v4058_v20 = vld [vmem:[#allocation2 + $0x784] ss:$24 sps:$4 sm:$0xff]  }
  0x68   :  { %2585 = vmatprep.subr.bf16.mxu1 %v3985_v21  ;;  %2560 = vmatprep.mubr.bf16.mxu0 %v4606_v44  ;;  %v4061_v21 = vld [vmem:[#allocation2 + $0xa84] ss:$24 sps:$4 sm:$0xff]  }
  0x69   :  { %2611 = vmatprep.mubr.bf16.mxu1 %v4620_v49 }
  0x6a   :  { %2535 = vmatpush1.bf16.msra.mxu0 %v3980_v22  ;;  %v4056_v22 = vld [vmem:[#allocation2 + $0x780] ss:$24 sps:$4 sm:$0xff]  }
  0x6b   :  { %2586 = vmatpush1.bf16.msra.mxu1 %v3983_v23  ;;  %2536 = vmatprep.subr.bf16.mxu0 %v3988_v24  ;;  %v4059_v23 = vld [vmem:[#allocation2 + $0xa80] ss:$24 sps:$4 sm:$0xff]   ;;  %v4064_v24 = vld [vmem:[#allocation2 + $0x15c] ss:$24 sps:$4 sm:$0xff]  }
  0x6c   :  { %2587 = vmatprep.subr.bf16.mxu1 %v3991_v25  ;;  %v4067_v25 = vld [vmem:[#allocation2 + $0x45c] ss:$24 sps:$4 sm:$0xff]  }
  0x6e   :  { %2537 = vmatpush1.bf16.msra.mxu0 %v3986_v30  ;;  %v4626_v30 = vcombine.low %v4597_v42, %v4602_v43  ;;  %v4078_v42 = vld [vmem:[#allocation2 + $0xfc] ss:$24 sps:$4 sm:$0xff]  }
  0x6f   :  { %2588 = vmatpush1.bf16.msra.mxu1 %v3989_v31  ;;  %2538 = vmatprep.subr.bf16.mxu0 %v3994_v34  ;;  %v4630_v31 = vcombine.low %v4611_v45, %v4616_v46  ;;  %v52_v34 = vld [vmem:[%s4830_s0 + $0x50] sm:$0xff] }
  0x70   :  { %2589 = vmatprep.subr.bf16.mxu1 %v3997_v35  ;;  %v53_v35 = vld [vmem:[%s4830_s0 + $0x58] sm:$0xff]  ;;  %v4646_v45 = vcombine.low %v52_v34, %v52_v34 }
  0x71   :  { %v4081_v43 = vld [vmem:[#allocation2 + $0x3fc] ss:$24 sps:$4 sm:$0xff]   ;;  %v4076_v46 = vld [vmem:[#allocation2 + $0xf8] ss:$24 sps:$4 sm:$0xff]  }
  0x72   :  { %2539 = vmatpush1.bf16.msra.mxu0 %v3992_v36  ;;  %v4070_v36 = vld [vmem:[#allocation2 + $0x12c] ss:$24 sps:$4 sm:$0xff]  }
  0x73   :  { %2590 = vmatpush1.bf16.msra.mxu1 %v3995_v37  ;;  %2540 = vmatprep.subr.bf16.mxu0 %v4000_v38  ;;  %v4073_v37 = vld [vmem:[#allocation2 + $0x42c] ss:$24 sps:$4 sm:$0xff]   ;;  %v4638_v38 = vcombine.high %v52_v34, %v52_v34  ;;  %v4138_v34 = vld [vmem:[#allocation2 + $0x218] ss:$24 sps:$4 sm:$0xff]  }
  0x74   :  { %2591 = vmatprep.subr.bf16.mxu1 %v4003_v39  ;;  %v4640_v39 = vcombine.high %v53_v35, %v53_v35 }
  0x76   :  { %2541 = vmatpush1.bf16.msra.mxu0 %v3998_v40  ;;  %v4068_v40 = vld [vmem:[#allocation2 + $0x128] ss:$24 sps:$4 sm:$0xff]  }
  0x77   :  { %2592 = vmatpush1.bf16.msra.mxu1 %v4001_v41  ;;  %2542 = vmatprep.subr.bf16.mxu0 %v4006_v47  ;;  %v4071_v41 = vld [vmem:[#allocation2 + $0x428] ss:$24 sps:$4 sm:$0xff]   ;;  %v4079_v47 = vld [vmem:[#allocation2 + $0x3f8] ss:$24 sps:$4 sm:$0xff]  }
  0x78   :  { %2593 = vmatprep.subr.bf16.mxu1 %v4009_v48  ;;  %v4648_v48 = vcombine.low %v53_v35, %v53_v35  ;;  %v4141_v35 = vld [vmem:[#allocation2 + $0x518] ss:$24 sps:$4 sm:$0xff]  }
  0x7a   :  { %2543 = vmatpush1.bf16.msra.mxu0 %v4004_v50  ;;  %v4086_v50 = vld [vmem:[#allocation2 + $0xcc] ss:$24 sps:$4 sm:$0xff]  }
  0x7b   :  { %2594 = vmatpush1.bf16.msra.mxu1 %v4007_v51  ;;  %2544 = vmatprep.subr.bf16.mxu0 %v4012_v52  ;;  %v4089_v51 = vld [vmem:[#allocation2 + $0x3cc] ss:$24 sps:$4 sm:$0xff]   ;;  %v4084_v52 = vld [vmem:[#allocation2 + $0xc8] ss:$24 sps:$4 sm:$0xff]  }
  0x7c   :  { %2595 = vmatprep.subr.bf16.mxu1 %v4015_v55  ;;  %v4087_v55 = vld [vmem:[#allocation2 + $0x3c8] ss:$24 sps:$4 sm:$0xff]  }
  0x7e   :  { %2545 = vmatpush2.bf16.msra.mxu0 %v4010_v56  ;;  %v4092_v56 = vld [vmem:[#allocation2 + $0x9c] ss:$24 sps:$4 sm:$0xff]  }
  0x7f   :  { %2596 = vmatpush2.bf16.msra.mxu1 %v4013_v57  ;;  %2546 = vmatprep.subr.bf16.mxu0 %v4018_v58  ;;  %v4095_v57 = vld [vmem:[#allocation2 + $0x39c] ss:$24 sps:$4 sm:$0xff]   ;;  %v4090_v58 = vld [vmem:[#allocation2 + $0x98] ss:$24 sps:$4 sm:$0xff]  }
  0x80   :  { %2597 = vmatprep.subr.bf16.mxu1 %v4021_v59  ;;  %v4093_v59 = vld [vmem:[#allocation2 + $0x398] ss:$24 sps:$4 sm:$0xff]  }
  0x82   :  { %2547 = vmatpush2.bf16.msra.mxu0 %v4016_v60  ;;  %v4098_v60 = vld [vmem:[#allocation2 + $0x6c] ss:$24 sps:$4 sm:$0xff]  }
  0x83   :  { %2598 = vmatpush2.bf16.msra.mxu1 %v4019_v61  ;;  %2548 = vmatprep.subr.bf16.mxu0 %v4024_v62  ;;  %v4101_v61 = vld [vmem:[#allocation2 + $0x36c] ss:$24 sps:$4 sm:$0xff]   ;;  %v4096_v62 = vld [vmem:[#allocation2 + $0x68] ss:$24 sps:$4 sm:$0xff]  }
  0x84   :  { %2599 = vmatprep.subr.bf16.mxu1 %v4027_v63  ;;  %v4099_v63 = vld [vmem:[#allocation2 + $0x368] ss:$24 sps:$4 sm:$0xff]  }
  0x86   :  { %2549 = vmatpush2.bf16.msra.mxu0 %v4022_v0  ;;  %v4104_v0 = vld [vmem:[#allocation2 + $0x3c] ss:$24 sps:$4 sm:$0xff]  }
  0x87   :  { %2600 = vmatpush2.bf16.msra.mxu1 %v4025_v1  ;;  %2550 = vmatprep.subr.bf16.mxu0 %v4030_v2  ;;  %v4107_v1 = vld [vmem:[#allocation2 + $0x33c] ss:$24 sps:$4 sm:$0xff]   ;;  %v4102_v2 = vld [vmem:[#allocation2 + $0x38] ss:$24 sps:$4 sm:$0xff]  }
  0x88   :  { %2601 = vmatprep.subr.bf16.mxu1 %v4033_v3  ;;  %v4105_v3 = vld [vmem:[#allocation2 + $0x338] ss:$24 sps:$4 sm:$0xff]  }
  0x8a   :  { %2551 = vmatpush2.bf16.msra.mxu0 %v4028_v4  ;;  %v4110_v4 = vld [vmem:[#allocation2 + $0xc] ss:$24 sps:$4 sm:$0xff]  }
  0x8b   :  { %2602 = vmatpush2.bf16.msra.mxu1 %v4031_v5  ;;  %2552 = vmatprep.subr.bf16.mxu0 %v4036_v6  ;;  %v4113_v5 = vld [vmem:[#allocation2 + $0x30c] ss:$24 sps:$4 sm:$0xff]   ;;  %v4108_v6 = vld [vmem:[#allocation2 + $0x8] ss:$24 sps:$4 sm:$0xff]  }
  0x8c   :  { %2603 = vmatprep.subr.bf16.mxu1 %v4039_v7  ;;  %v4111_v7 = vld [vmem:[#allocation2 + $0x308] ss:$24 sps:$4 sm:$0xff]  }
  0x8e   :  { %2553 = vmatpush2.bf16.msra.mxu0 %v4034_v10  ;;  %v4116_v10 = vld [vmem:[#allocation2 + $0x2dc] ss:$24 sps:$4 sm:$0xff]  }
  0x8f   :  { %2604 = vmatpush2.bf16.msra.mxu1 %v4037_v11  ;;  %2554 = vmatprep.subr.bf16.mxu0 %v4045_v12  ;;  %v4119_v11 = vld [vmem:[#allocation2 + $0x5dc] ss:$24 sps:$4 sm:$0xff]   ;;  %v4114_v12 = vld [vmem:[#allocation2 + $0x2d8] ss:$24 sps:$4 sm:$0xff]  }
  0x90   :  { %2605 = vmatprep.subr.bf16.mxu1 %v4048_v13  ;;  %v4117_v13 = vld [vmem:[#allocation2 + $0x5d8] ss:$24 sps:$4 sm:$0xff]  }
  0x92   :  { %2555 = vmatpush2.bf16.msra.mxu0 %v4043_v14  ;;  %v4122_v14 = vld [vmem:[#allocation2 + $0x2ac] ss:$24 sps:$4 sm:$0xff]  }
  0x93   :  { %2606 = vmatpush2.bf16.msra.mxu1 %v4046_v15  ;;  %2556 = vmatprep.subr.bf16.mxu0 %v4052_v16  ;;  %v4125_v15 = vld [vmem:[#allocation2 + $0x5ac] ss:$24 sps:$4 sm:$0xff]   ;;  %v4120_v16 = vld [vmem:[#allocation2 + $0x2a8] ss:$24 sps:$4 sm:$0xff]  }
  0x94   :  { %2607 = vmatprep.subr.bf16.mxu1 %v4055_v17  ;;  %v4123_v17 = vld [vmem:[#allocation2 + $0x5a8] ss:$24 sps:$4 sm:$0xff]  }
  0x96   :  { %2557 = vmatpush2.bf16.msra.mxu0 %v4050_v18  ;;  %v4128_v18 = vld [vmem:[#allocation2 + $0x27c] ss:$24 sps:$4 sm:$0xff]  }
  0x97   :  { %2608 = vmatpush2.bf16.msra.mxu1 %v4053_v19  ;;  %2558 = vmatprep.subr.bf16.mxu0 %v4058_v20  ;;  %v4131_v19 = vld [vmem:[#allocation2 + $0x57c] ss:$24 sps:$4 sm:$0xff]   ;;  %v4126_v20 = vld [vmem:[#allocation2 + $0x278] ss:$24 sps:$4 sm:$0xff]  }
  0x98   :  { %2609 = vmatprep.subr.bf16.mxu1 %v4061_v21  ;;  %v4129_v21 = vld [vmem:[#allocation2 + $0x578] ss:$24 sps:$4 sm:$0xff]  }
  0x9a   :  { %2559 = vmatpush2.bf16.msra.mxu0 %v4056_v22  ;;  %v4134_v22 = vld [vmem:[#allocation2 + $0x24c] ss:$24 sps:$4 sm:$0xff]  }
  0x9b   :  { %2610 = vmatpush2.bf16.msra.mxu1 %v4059_v23  ;;  %2630 = vmatprep.subr.bf16.mxu0 %v4064_v24  ;;  %v4137_v23 = vld [vmem:[#allocation2 + $0x54c] ss:$24 sps:$4 sm:$0xff]   ;;  %v4132_v24 = vld [vmem:[#allocation2 + $0x248] ss:$24 sps:$4 sm:$0xff]  }
  0x9c   :  { %2681 = vmatprep.subr.bf16.mxu1 %v4067_v25  ;;  %v4135_v25 = vld [vmem:[#allocation2 + $0x548] ss:$24 sps:$4 sm:$0xff]  }
  0x9d   :  { %2561 = vmatmul.mubr.bf16.vlgmr.msra.gmra.mxu0 %v4626_v30 }
  0x9e   :  { %2612 = vmatmul.mubr.bf16.vlgmr.msra.gmra.mxu1 %v4630_v31  ;;  %2631 = vmatpush1.bf16.msra.mxu0 %v4062_v26  ;;  %v4140_v26 = vld [vmem:[#allocation2 + $0x21c] ss:$24 sps:$4 sm:$0xff]  }
  0x9f   :  { %2682 = vmatpush1.bf16.msra.mxu1 %v4065_v29  ;;  %2632 = vmatprep.subr.bf16.mxu0 %v4070_v36  ;;  %v4143_v29 = vld [vmem:[#allocation2 + $0x51c] ss:$24 sps:$4 sm:$0xff]   ;;  %v4146_v36 = vld [vmem:[#allocation2 + $0x1ec] ss:$24 sps:$4 sm:$0xff]  }
  0xa0   :  { %2683 = vmatprep.subr.bf16.mxu1 %v4073_v37  ;;  %2570 = vmatprep.mubr.bf16.mxu0 %v4638_v38  ;;  %v4149_v37 = vld [vmem:[#allocation2 + $0x4ec] ss:$24 sps:$4 sm:$0xff]  }
  0xa1   :  { %2621 = vmatprep.mubr.bf16.mxu1 %v4640_v39 }
  0xa2   :  { %2633 = vmatpush1.bf16.msra.mxu0 %v4068_v40  ;;  %v4144_v40 = vld [vmem:[#allocation2 + $0x1e8] ss:$24 sps:$4 sm:$0xff]  }
  0xa3   :  { %2684 = vmatpush1.bf16.msra.mxu1 %v4071_v41  ;;  %2634 = vmatprep.subr.bf16.mxu0 %v4078_v42  ;;  %v4147_v41 = vld [vmem:[#allocation2 + $0x4e8] ss:$24 sps:$4 sm:$0xff]   ;;  %v4152_v42 = vld [vmem:[#allocation2 + $0x1bc] ss:$24 sps:$4 sm:$0xff]  }
  0xa4   :  { %2685 = vmatprep.subr.bf16.mxu1 %v4081_v43  ;;  %v4155_v43 = vld [vmem:[#allocation2 + $0x4bc] ss:$24 sps:$4 sm:$0xff]  }
  0xa5   :  { %2571 = vmatmul.mubr.bf16.gmra.mxu0 %v4646_v45 }
  0xa6   :  { %2622 = vmatmul.mubr.bf16.gmra.mxu1 %v4648_v48  ;;  %2635 = vmatpush1.bf16.msra.mxu0 %v4076_v46  ;;  %v4150_v46 = vld [vmem:[#allocation2 + $0x1b8] ss:$24 sps:$4 sm:$0xff]  }
  0xa7   :  { %2686 = vmatpush1.bf16.msra.mxu1 %v4079_v47  ;;  %2636 = vmatprep.subr.bf16.mxu0 %v4086_v50  ;;  %v4153_v47 = vld [vmem:[#allocation2 + $0x4b8] ss:$24 sps:$4 sm:$0xff]   ;;  %v4158_v50 = vld [vmem:[#allocation2 + $0x18c] ss:$24 sps:$4 sm:$0xff]  }
  0xa8   :  { %2687 = vmatprep.subr.bf16.mxu1 %v4089_v51  ;;  %2662 = vmatprep.mubr.bf16.mxu0 %v4564_v53  ;;  %v4161_v51 = vld [vmem:[#allocation2 + $0x48c] ss:$24 sps:$4 sm:$0xff]  }
  0xa9   :  { %2713 = vmatprep.mubr.bf16.mxu1 %v4566_v54 }
  0xaa   :  { %2637 = vmatpush1.bf16.msra.mxu0 %v4084_v52  ;;  %v4156_v52 = vld [vmem:[#allocation2 + $0x188] ss:$24 sps:$4 sm:$0xff]  }
  0xab   :  { %2688 = vmatpush1.bf16.msra.mxu1 %v4087_v55  ;;  %2638 = vmatprep.subr.bf16.mxu0 %v4092_v56  ;;  %v4159_v55 = vld [vmem:[#allocation2 + $0x488] ss:$24 sps:$4 sm:$0xff]   ;;  %v4164_v56 = vld [vmem:[#allocation2 + $0x75c] ss:$24 sps:$4 sm:$0xff]  }
  0xac   :  { %2689 = vmatprep.subr.bf16.mxu1 %v4095_v57  ;;  %v4167_v57 = vld [vmem:[#allocation2 + $0xa5c] ss:$24 sps:$4 sm:$0xff]  }
  0xae   :  { %2639 = vmatpush1.bf16.msra.mxu0 %v4090_v58  ;;  %v4162_v58 = vld [vmem:[#allocation2 + $0x758] ss:$24 sps:$4 sm:$0xff]  }
  0xaf   :  { %2690 = vmatpush1.bf16.msra.mxu1 %v4093_v59  ;;  %2640 = vmatprep.subr.bf16.mxu0 %v4098_v60  ;;  %v4165_v59 = vld [vmem:[#allocation2 + $0xa58] ss:$24 sps:$4 sm:$0xff]   ;;  %v4170_v60 = vld [vmem:[#allocation2 + $0x72c] ss:$24 sps:$4 sm:$0xff]  }
  0xb0   :  { %2691 = vmatprep.subr.bf16.mxu1 %v4101_v61  ;;  %v4173_v61 = vld [vmem:[#allocation2 + $0xa2c] ss:$24 sps:$4 sm:$0xff]  }
  0xb2   :  { %2641 = vmatpush1.bf16.msra.mxu0 %v4096_v62  ;;  %v4168_v62 = vld [vmem:[#allocation2 + $0x728] ss:$24 sps:$4 sm:$0xff]  }
  0xb3   :  { %2692 = vmatpush1.bf16.msra.mxu1 %v4099_v63  ;;  %2642 = vmatprep.subr.bf16.mxu0 %v4104_v0  ;;  %v4171_v63 = vld [vmem:[#allocation2 + $0xa28] ss:$24 sps:$4 sm:$0xff]   ;;  %v4176_v0 = vld [vmem:[#allocation2 + $0x6fc] ss:$24 sps:$4 sm:$0xff]  }
  0xb4   :  { %2693 = vmatprep.subr.bf16.mxu1 %v4107_v1  ;;  %v4179_v1 = vld [vmem:[#allocation2 + $0x9fc] ss:$24 sps:$4 sm:$0xff]  }
  0xb6   :  { %2643 = vmatpush1.bf16.msra.mxu0 %v4102_v2  ;;  %v4174_v2 = vld [vmem:[#allocation2 + $0x6f8] ss:$24 sps:$4 sm:$0xff]  }
  0xb7   :  { %2694 = vmatpush1.bf16.msra.mxu1 %v4105_v3  ;;  %2644 = vmatprep.subr.bf16.mxu0 %v4110_v4  ;;  %v4177_v3 = vld [vmem:[#allocation2 + $0x9f8] ss:$24 sps:$4 sm:$0xff]   ;;  %v4182_v4 = vld [vmem:[#allocation2 + $0x6cc] ss:$24 sps:$4 sm:$0xff]  }
  0xb8   :  { %2695 = vmatprep.subr.bf16.mxu1 %v4113_v5  ;;  %v4185_v5 = vld [vmem:[#allocation2 + $0x9cc] ss:$24 sps:$4 sm:$0xff]  }
  0xba   :  { %2645 = vmatpush1.bf16.msra.mxu0 %v4108_v6  ;;  %v4180_v6 = vld [vmem:[#allocation2 + $0x6c8] ss:$24 sps:$4 sm:$0xff]  }
  0xbb   :  { %2696 = vmatpush1.bf16.msra.mxu1 %v4111_v7  ;;  %2646 = vmatprep.subr.bf16.mxu0 %v4116_v10  ;;  %v4183_v7 = vld [vmem:[#allocation2 + $0x9c8] ss:$24 sps:$4 sm:$0xff]   ;;  %v4188_v10 = vld [vmem:[#allocation2 + $0x69c] ss:$24 sps:$4 sm:$0xff]  }
  0xbc   :  { %2697 = vmatprep.subr.bf16.mxu1 %v4119_v11  ;;  %v4191_v11 = vld [vmem:[#allocation2 + $0x99c] ss:$24 sps:$4 sm:$0xff]  }
  0xbe   :  { %2647 = vmatpush2.bf16.msra.mxu0 %v4114_v12  ;;  %v4186_v12 = vld [vmem:[#allocation2 + $0x698] ss:$24 sps:$4 sm:$0xff]  }
  0xbf   :  { %2698 = vmatpush2.bf16.msra.mxu1 %v4117_v13  ;;  %2648 = vmatprep.subr.bf16.mxu0 %v4122_v14  ;;  %v4189_v13 = vld [vmem:[#allocation2 + $0x998] ss:$24 sps:$4 sm:$0xff]   ;;  %v4194_v14 = vld [vmem:[#allocation2 + $0x66c] ss:$24 sps:$4 sm:$0xff]  }
  0xc0   :  { %2699 = vmatprep.subr.bf16.mxu1 %v4125_v15  ;;  %v4197_v15 = vld [vmem:[#allocation2 + $0x96c] ss:$24 sps:$4 sm:$0xff]  }
  0xc2   :  { %2649 = vmatpush2.bf16.msra.mxu0 %v4120_v16  ;;  %v4192_v16 = vld [vmem:[#allocation2 + $0x668] ss:$24 sps:$4 sm:$0xff]  }
  0xc3   :  { %2700 = vmatpush2.bf16.msra.mxu1 %v4123_v17  ;;  %2650 = vmatprep.subr.bf16.mxu0 %v4128_v18  ;;  %v4195_v17 = vld [vmem:[#allocation2 + $0x968] ss:$24 sps:$4 sm:$0xff]   ;;  %v4200_v18 = vld [vmem:[#allocation2 + $0x63c] ss:$24 sps:$4 sm:$0xff]  }
  0xc4   :  { %2701 = vmatprep.subr.bf16.mxu1 %v4131_v19  ;;  %v4203_v19 = vld [vmem:[#allocation2 + $0x93c] ss:$24 sps:$4 sm:$0xff]  }
  0xc6   :  { %2651 = vmatpush2.bf16.msra.mxu0 %v4126_v20  ;;  %v4198_v20 = vld [vmem:[#allocation2 + $0x638] ss:$24 sps:$4 sm:$0xff]  }
  0xc7   :  { %2702 = vmatpush2.bf16.msra.mxu1 %v4129_v21  ;;  %2652 = vmatprep.subr.bf16.mxu0 %v4134_v22  ;;  %v4201_v21 = vld [vmem:[#allocation2 + $0x938] ss:$24 sps:$4 sm:$0xff]   ;;  %v4206_v22 = vld [vmem:[#allocation2 + $0x60c] ss:$24 sps:$4 sm:$0xff]  }
  0xc8   :  { %2703 = vmatprep.subr.bf16.mxu1 %v4137_v23  ;;  %v4209_v23 = vld [vmem:[#allocation2 + $0x90c] ss:$24 sps:$4 sm:$0xff]  }
  0xca   :  { %2653 = vmatpush2.bf16.msra.mxu0 %v4132_v24  ;;  %v4204_v24 = vld [vmem:[#allocation2 + $0x608] ss:$24 sps:$4 sm:$0xff]  }
  0xcb   :  { %2704 = vmatpush2.bf16.msra.mxu1 %v4135_v25  ;;  %2654 = vmatprep.subr.bf16.mxu0 %v4140_v26  ;;  %v4207_v25 = vld [vmem:[#allocation2 + $0x908] ss:$24 sps:$4 sm:$0xff]   ;;  %v4212_v26 = vld [vmem:[#allocation2 + $0x8dc] ss:$24 sps:$4 sm:$0xff]  }
  0xcc   :  { %2705 = vmatprep.subr.bf16.mxu1 %v4143_v29  ;;  %v4215_v29 = vld [vmem:[#allocation2 + $0xbdc] ss:$24 sps:$4 sm:$0xff]  }
  0xce   :  { %2655 = vmatpush2.bf16.msra.mxu0 %v4138_v34  ;;  %v4210_v34 = vld [vmem:[#allocation2 + $0x8d8] ss:$24 sps:$4 sm:$0xff]  }
  0xcf   :  { %2706 = vmatpush2.bf16.msra.mxu1 %v4141_v35  ;;  %2656 = vmatprep.subr.bf16.mxu0 %v4146_v36  ;;  %v4213_v35 = vld [vmem:[#allocation2 + $0xbd8] ss:$24 sps:$4 sm:$0xff]   ;;  %v4218_v36 = vld [vmem:[#allocation2 + $0x8ac] ss:$24 sps:$4 sm:$0xff]  }
  0xd0   :  { %2707 = vmatprep.subr.bf16.mxu1 %v4149_v37  ;;  %v4221_v37 = vld [vmem:[#allocation2 + $0xbac] ss:$24 sps:$4 sm:$0xff]  }
  0xd2   :  { %2657 = vmatpush2.bf16.msra.mxu0 %v4144_v40  ;;  %v4216_v40 = vld [vmem:[#allocation2 + $0x8a8] ss:$24 sps:$4 sm:$0xff]  }
  0xd3   :  { %2708 = vmatpush2.bf16.msra.mxu1 %v4147_v41  ;;  %2658 = vmatprep.subr.bf16.mxu0 %v4152_v42  ;;  %v4219_v41 = vld [vmem:[#allocation2 + $0xba8] ss:$24 sps:$4 sm:$0xff]   ;;  %v4224_v42 = vld [vmem:[#allocation2 + $0x87c] ss:$24 sps:$4 sm:$0xff]  }
  0xd4   :  { %2709 = vmatprep.subr.bf16.mxu1 %v4155_v43  ;;  %v4227_v43 = vld [vmem:[#allocation2 + $0xb7c] ss:$24 sps:$4 sm:$0xff]  }
  0xd6   :  { %2659 = vmatpush2.bf16.msra.mxu0 %v4150_v46  ;;  %v4222_v46 = vld [vmem:[#allocation2 + $0x878] ss:$24 sps:$4 sm:$0xff]  }
  0xd7   :  { %2710 = vmatpush2.bf16.msra.mxu1 %v4153_v47  ;;  %2660 = vmatprep.subr.bf16.mxu0 %v4158_v50  ;;  %v4225_v47 = vld [vmem:[#allocation2 + $0xb78] ss:$24 sps:$4 sm:$0xff]   ;;  %v4230_v50 = vld [vmem:[#allocation2 + $0x84c] ss:$24 sps:$4 sm:$0xff]  }
  0xd8   :  { %2711 = vmatprep.subr.bf16.mxu1 %v4161_v51  ;;  %v4233_v51 = vld [vmem:[#allocation2 + $0xb4c] ss:$24 sps:$4 sm:$0xff]  }
  0xda   :  { %2661 = vmatpush2.bf16.msra.mxu0 %v4156_v52  ;;  %v4228_v52 = vld [vmem:[#allocation2 + $0x848] ss:$24 sps:$4 sm:$0xff]  }
  0xdb   :  { %2712 = vmatpush2.bf16.msra.mxu1 %v4159_v55  ;;  %2732 = vmatprep.subr.bf16.mxu0 %v4164_v56  ;;  %v4231_v55 = vld [vmem:[#allocation2 + $0xb48] ss:$24 sps:$4 sm:$0xff]   ;;  %v4236_v56 = vld [vmem:[#allocation2 + $0x81c] ss:$24 sps:$4 sm:$0xff]  }
  0xdc   :  { %2783 = vmatprep.subr.bf16.mxu1 %v4167_v57  ;;  %v4239_v57 = vld [vmem:[#allocation2 + $0xb1c] ss:$24 sps:$4 sm:$0xff]  }
  0xdd   :  { %2663 = vmatmul.mubr.bf16.vlgmr.msra.gmra.mxu0 %v4570_v8 }
  0xde   :  { %2714 = vmatmul.mubr.bf16.vlgmr.msra.gmra.mxu1 %v4572_v9  ;;  %2733 = vmatpush1.bf16.msra.mxu0 %v4162_v58  ;;  %v4234_v58 = vld [vmem:[#allocation2 + $0x818] ss:$24 sps:$4 sm:$0xff]  }
  0xdf   :  { %2784 = vmatpush1.bf16.msra.mxu1 %v4165_v59  ;;  %2734 = vmatprep.subr.bf16.mxu0 %v4170_v60  ;;  %v4237_v59 = vld [vmem:[#allocation2 + $0xb18] ss:$24 sps:$4 sm:$0xff]   ;;  %v4242_v60 = vld [vmem:[#allocation2 + $0x7ec] ss:$24 sps:$4 sm:$0xff]  }
  0xe0   :  { %2785 = vmatprep.subr.bf16.mxu1 %v4173_v61  ;;  %2672 = vmatprep.mubr.bf16.mxu0 %v4579_v27  ;;  %v4245_v61 = vld [vmem:[#allocation2 + $0xaec] ss:$24 sps:$4 sm:$0xff]  }
  0xe1   :  { %2723 = vmatprep.mubr.bf16.mxu1 %v4586_v32 }
  0xe2   :  { %2735 = vmatpush1.bf16.msra.mxu0 %v4168_v62  ;;  %v4240_v62 = vld [vmem:[#allocation2 + $0x7e8] ss:$24 sps:$4 sm:$0xff]  }
  0xe3   :  { %2786 = vmatpush1.bf16.msra.mxu1 %v4171_v63  ;;  %2736 = vmatprep.subr.bf16.mxu0 %v4176_v0  ;;  %v4243_v63 = vld [vmem:[#allocation2 + $0xae8] ss:$24 sps:$4 sm:$0xff]   ;;  %v4248_v0 = vld [vmem:[#allocation2 + $0x7bc] ss:$24 sps:$4 sm:$0xff]  }
  0xe4   :  { %2787 = vmatprep.subr.bf16.mxu1 %v4179_v1  ;;  %v4251_v1 = vld [vmem:[#allocation2 + $0xabc] ss:$24 sps:$4 sm:$0xff]  }
  0xe5   :  { %2673 = vmatmul.mubr.bf16.gmra.mxu0 %v4581_v28 }
  0xe6   :  { %2724 = vmatmul.mubr.bf16.gmra.mxu1 %v4588_v33  ;;  %2737 = vmatpush1.bf16.msra.mxu0 %v4174_v2  ;;  %v4246_v2 = vld [vmem:[#allocation2 + $0x7b8] ss:$24 sps:$4 sm:$0xff]  }
  0xe7   :  { %2788 = vmatpush1.bf16.msra.mxu1 %v4177_v3  ;;  %2738 = vmatprep.subr.bf16.mxu0 %v4182_v4  ;;  %v4249_v3 = vld [vmem:[#allocation2 + $0xab8] ss:$24 sps:$4 sm:$0xff]   ;;  %v4254_v4 = vld [vmem:[#allocation2 + $0x78c] ss:$24 sps:$4 sm:$0xff]  }
  0xe8   :  { %2789 = vmatprep.subr.bf16.mxu1 %v4185_v5  ;;  %2764 = vmatprep.mubr.bf16.mxu0 %v4606_v44  ;;  %v4257_v5 = vld [vmem:[#allocation2 + $0xa8c] ss:$24 sps:$4 sm:$0xff]  }
  0xe9   :  { %2815 = vmatprep.mubr.bf16.mxu1 %v4620_v49 }
  0xea   :  { %2739 = vmatpush1.bf16.msra.mxu0 %v4180_v6  ;;  %v4252_v6 = vld [vmem:[#allocation2 + $0x788] ss:$24 sps:$4 sm:$0xff]  }
  0xeb   :  { %2790 = vmatpush1.bf16.msra.mxu1 %v4183_v7  ;;  %2740 = vmatprep.subr.bf16.mxu0 %v4188_v10  ;;  %v4255_v7 = vld [vmem:[#allocation2 + $0xa88] ss:$24 sps:$4 sm:$0xff]   ;;  %v4260_v10 = vld [vmem:[#allocation2 + $0x164] ss:$24 sps:$4 sm:$0xff]  }
  0xec   :  { %2791 = vmatprep.subr.bf16.mxu1 %v4191_v11  ;;  %v4263_v11 = vld [vmem:[#allocation2 + $0x464] ss:$24 sps:$4 sm:$0xff]  }
  0xee   :  { %2741 = vmatpush1.bf16.msra.mxu0 %v4186_v12  ;;  %v4258_v12 = vld [vmem:[#allocation2 + $0x160] ss:$24 sps:$4 sm:$0xff]  }
  0xef   :  { %2792 = vmatpush1.bf16.msra.mxu1 %v4189_v13  ;;  %2742 = vmatprep.subr.bf16.mxu0 %v4194_v14  ;;  %v4261_v13 = vld [vmem:[#allocation2 + $0x460] ss:$24 sps:$4 sm:$0xff]   ;;  %v4266_v14 = vld [vmem:[#allocation2 + $0x134] ss:$24 sps:$4 sm:$0xff]  }
  0xf0   :  { %2793 = vmatprep.subr.bf16.mxu1 %v4197_v15  ;;  %v4269_v15 = vld [vmem:[#allocation2 + $0x434] ss:$24 sps:$4 sm:$0xff]  }
  0xf2   :  { %2743 = vmatpush1.bf16.msra.mxu0 %v4192_v16 }
  0xf3   :  { %2794 = vmatpush1.bf16.msra.mxu1 %v4195_v17  ;;  %2744 = vmatprep.subr.bf16.mxu0 %v4200_v18 }
  0xf4   :  { %2795 = vmatprep.subr.bf16.mxu1 %v4203_v19  ;;  %v4264_v19 = vld [vmem:[#allocation2 + $0x130] ss:$24 sps:$4 sm:$0xff]  }
  0xf6   :  { %2745 = vmatpush1.bf16.msra.mxu0 %v4198_v20  ;;  %v4267_v20 = vld [vmem:[#allocation2 + $0x430] ss:$24 sps:$4 sm:$0xff]  }
  0xf7   :  { %2796 = vmatpush1.bf16.msra.mxu1 %v4201_v21  ;;  %2746 = vmatprep.subr.bf16.mxu0 %v4206_v22 }
  0xf8   :  { %2797 = vmatprep.subr.bf16.mxu1 %v4209_v23  ;;  %v4272_v23 = vld [vmem:[#allocation2 + $0x104] ss:$24 sps:$4 sm:$0xff]  }
  0xfa   :  { %2747 = vmatpush1.bf16.msra.mxu0 %v4204_v24  ;;  %v4275_v24 = vld [vmem:[#allocation2 + $0x404] ss:$24 sps:$4 sm:$0xff]  }
  0xfb   :  { %2798 = vmatpush1.bf16.msra.mxu1 %v4207_v25  ;;  %2748 = vmatprep.subr.bf16.mxu0 %v4212_v26 }
  0xfc   :  { %2799 = vmatprep.subr.bf16.mxu1 %v4215_v29 }
  0xfe   :  { %2749 = vmatpush2.bf16.msra.mxu0 %v4210_v34 }
  0xff   :  { %2800 = vmatpush2.bf16.msra.mxu1 %v4213_v35  ;;  %2750 = vmatprep.subr.bf16.mxu0 %v4218_v36  ;;  %v4270_v35 = vld [vmem:[#allocation2 + $0x100] ss:$24 sps:$4 sm:$0xff]  }
 0x100   :  { %2801 = vmatprep.subr.bf16.mxu1 %v4221_v37  ;;  %v4273_v36 = vld [vmem:[#allocation2 + $0x400] ss:$24 sps:$4 sm:$0xff]  }
 0x102   :  { %2751 = vmatpush2.bf16.msra.mxu0 %v4216_v40 }
 0x103   :  { %2802 = vmatpush2.bf16.msra.mxu1 %v4219_v41  ;;  %2752 = vmatprep.subr.bf16.mxu0 %v4224_v42  ;;  %v4278_v41 = vld [vmem:[#allocation2 + $0xd4] ss:$24 sps:$4 sm:$0xff]  }
 0x104   :  { %2803 = vmatprep.subr.bf16.mxu1 %v4227_v43  ;;  %v4281_v42 = vld [vmem:[#allocation2 + $0x3d4] ss:$24 sps:$4 sm:$0xff]  }
 0x106   :  { %2753 = vmatpush2.bf16.msra.mxu0 %v4222_v46  ;;  %v4276_v46 = vld [vmem:[#allocation2 + $0xd0] ss:$24 sps:$4 sm:$0xff]  }
 0x107   :  { %2804 = vmatpush2.bf16.msra.mxu1 %v4225_v47  ;;  %2754 = vmatprep.subr.bf16.mxu0 %v4230_v50  ;;  %v4279_v47 = vld [vmem:[#allocation2 + $0x3d0] ss:$24 sps:$4 sm:$0xff]   ;;  %v4284_v50 = vld [vmem:[#allocation2 + $0xa4] ss:$24 sps:$4 sm:$0xff]  }
 0x108   :  { %2805 = vmatprep.subr.bf16.mxu1 %v4233_v51  ;;  %v4287_v51 = vld [vmem:[#allocation2 + $0x3a4] ss:$24 sps:$4 sm:$0xff]  }
 0x10a   :  { %2755 = vmatpush2.bf16.msra.mxu0 %v4228_v52  ;;  %v4282_v52 = vld [vmem:[#allocation2 + $0xa0] ss:$24 sps:$4 sm:$0xff]  }
 0x10b   :  { %2806 = vmatpush2.bf16.msra.mxu1 %v4231_v55  ;;  %2756 = vmatprep.subr.bf16.mxu0 %v4236_v56  ;;  %v4285_v55 = vld [vmem:[#allocation2 + $0x3a0] ss:$24 sps:$4 sm:$0xff]   ;;  %v4290_v56 = vld [vmem:[#allocation2 + $0x74] ss:$24 sps:$4 sm:$0xff]  }
 0x10c   :  { %2807 = vmatprep.subr.bf16.mxu1 %v4239_v57  ;;  %v4293_v57 = vld [vmem:[#allocation2 + $0x374] ss:$24 sps:$4 sm:$0xff]  }
 0x10e   :  { %2757 = vmatpush2.bf16.msra.mxu0 %v4234_v58 }
 0x10f   :  { %2808 = vmatpush2.bf16.msra.mxu1 %v4237_v59  ;;  %2758 = vmatprep.subr.bf16.mxu0 %v4242_v60  ;;  %v4288_v60 = vld [vmem:[#allocation2 + $0x70] ss:$24 sps:$4 sm:$0xff]  }
 0x110   :  { %2809 = vmatprep.subr.bf16.mxu1 %v4245_v61  ;;  %v4291_v61 = vld [vmem:[#allocation2 + $0x370] ss:$24 sps:$4 sm:$0xff]  }
 0x112   :  { %2759 = vmatpush2.bf16.msra.mxu0 %v4240_v62 }
 0x113   :  { %2810 = vmatpush2.bf16.msra.mxu1 %v4243_v63  ;;  %2760 = vmatprep.subr.bf16.mxu0 %v4248_v0 }
 0x114   :  { %2811 = vmatprep.subr.bf16.mxu1 %v4251_v1 }
 0x116   :  { %2761 = vmatpush2.bf16.msra.mxu0 %v4246_v2 }
 0x117   :  { %2812 = vmatpush2.bf16.msra.mxu1 %v4249_v3  ;;  %2762 = vmatprep.subr.bf16.mxu0 %v4254_v4  ;;  %v4294_v4 = vld [vmem:[#allocation2 + $0x40] ss:$24 sps:$4 sm:$0xff]  }
 0x118   :  { %2813 = vmatprep.subr.bf16.mxu1 %v4257_v5  ;;  %v4297_v5 = vld [vmem:[#allocation2 + $0x340] ss:$24 sps:$4 sm:$0xff]  }
 0x11a   :  { %2763 = vmatpush2.bf16.msra.mxu0 %v4252_v6  ;;  %v4302_v6 = vld [vmem:[#allocation2 + $0x14] ss:$24 sps:$4 sm:$0xff]  }
 0x11b   :  { %2814 = vmatpush2.bf16.msra.mxu1 %v4255_v7  ;;  %2834 = vmatprep.subr.bf16.mxu0 %v4260_v10  ;;  %v4305_v7 = vld [vmem:[#allocation2 + $0x314] ss:$24 sps:$4 sm:$0xff]  }
 0x11c   :  { %2885 = vmatprep.subr.bf16.mxu1 %v4263_v11 }
 0x11d   :  { %v2460_v16 = vpop.f32.mrf.mxu0  ;;  %2765 = vmatmul.mubr.bf16.vlgmr.msra.gmra.mxu0 %v4626_v30 }
 0x11e   :  { %v2511_v17 = vpop.f32.mrf.mxu1  ;;  %2816 = vmatmul.mubr.bf16.vlgmr.msra.gmra.mxu1 %v4630_v31  ;;  %2835 = vmatpush1.bf16.msra.mxu0 %v4258_v12  ;;  %v4300_v12 = vld [vmem:[#allocation2 + $0x10] ss:$24 sps:$4 sm:$0xff]  }
 0x11f   :  { %v4664_v18 = vadd.f32 %v2511_v17, %v2460_v16  ;;  %2886 = vmatpush1.bf16.msra.mxu1 %v4261_v13  ;;  %v2462_v21 = vpop.f32.mrf.mxu0  ;;  %2836 = vmatprep.subr.bf16.mxu0 %v4266_v14  ;;  %v4303_v13 = vld [vmem:[#allocation2 + $0x310] ss:$24 sps:$4 sm:$0xff]   ;;  %v4308_v14 = vld [vmem:[#allocation2 + $0x2e4] ss:$24 sps:$4 sm:$0xff]   ;;  %v4306_v16 = vld [vmem:[#allocation2 + $0x2e0] ss:$24 sps:$4 sm:$0xff]  }
 0x120   :  { %v2513_v22 = vpop.f32.mrf.mxu1  ;;  %2887 = vmatprep.subr.bf16.mxu1 %v4269_v15  ;;  %2774 = vmatprep.mubr.bf16.mxu0 %v4638_v38  ;;  %v4311_v15 = vld [vmem:[#allocation2 + $0x5e4] ss:$24 sps:$4 sm:$0xff]   ;;  %v4309_v17 = vld [vmem:[#allocation2 + $0x5e0] ss:$24 sps:$4 sm:$0xff]  }
 0x121   :  { %v4666_v25 = vadd.f32 %v2513_v22, %v2462_v21  ;;  %2825 = vmatprep.mubr.bf16.mxu1 %v4640_v39  ;;  %v2464_v26 = vpop.f32.mrf.mxu0  ;;  %v4312_v21 = vld [vmem:[#allocation2 + $0x2b0] ss:$24 sps:$4 sm:$0xff]  }
 0x122   :  { %v2515_v29 = vpop.f32.mrf.mxu1  ;;  %2837 = vmatpush1.bf16.msra.mxu0 %v4264_v19  ;;  %v4314_v19 = vld [vmem:[#allocation2 + $0x2b4] ss:$24 sps:$4 sm:$0xff]   ;;  %v4315_v22 = vld [vmem:[#allocation2 + $0x5b0] ss:$24 sps:$4 sm:$0xff]  }
 0x123   :  { %v4670_v34 = vadd.f32 %v2515_v29, %v2464_v26  ;;  %2888 = vmatpush1.bf16.msra.mxu1 %v4267_v20  ;;  %v2466_v37 = vpop.f32.mrf.mxu0  ;;  %2838 = vmatprep.subr.bf16.mxu0 %v4272_v23  ;;  %v4317_v20 = vld [vmem:[#allocation2 + $0x5b4] ss:$24 sps:$4 sm:$0xff]   ;;  %v4320_v23 = vld [vmem:[#allocation2 + $0x284] ss:$24 sps:$4 sm:$0xff]   ;;  %v4318_v26 = vld [vmem:[#allocation2 + $0x280] ss:$24 sps:$4 sm:$0xff]  }
 0x124   :  { %v2517_v40 = vpop.f32.mrf.mxu1  ;;  %2889 = vmatprep.subr.bf16.mxu1 %v4275_v24  ;;  %v4323_v24 = vld [vmem:[#allocation2 + $0x584] ss:$24 sps:$4 sm:$0xff]   ;;  %v4321_v29 = vld [vmem:[#allocation2 + $0x580] ss:$24 sps:$4 sm:$0xff]  }
 0x125   :  { %v4672_v43 = vadd.f32 %v2517_v40, %v2466_v37  ;;  %2775 = vmatmul.mubr.bf16.gmra.mxu0 %v4646_v45  ;;  %v2470_v58 = vpop.f32.mrf.mxu0  ;;  %v4324_v37 = vld [vmem:[#allocation2 + $0x250] ss:$24 sps:$4 sm:$0xff]  }
 0x126   :  { %2826 = vmatmul.mubr.bf16.gmra.mxu1 %v4648_v48  ;;  %2839 = vmatpush1.bf16.msra.mxu0 %v4270_v35  ;;  %v2521_v59 = vpop.f32.mrf.mxu1  ;;  %v4326_v35 = vld [vmem:[#allocation2 + $0x254] ss:$24 sps:$4 sm:$0xff]   ;;  %v4327_v40 = vld [vmem:[#allocation2 + $0x550] ss:$24 sps:$4 sm:$0xff]  }
 0x127   :  { %2890 = vmatpush1.bf16.msra.mxu1 %v4273_v36  ;;  %2840 = vmatprep.subr.bf16.mxu0 %v4278_v41  ;;  %v4678_v62 = vadd.f32 %v2521_v59, %v2470_v58  ;;  %v2472_v63 = vpop.f32.mrf.mxu0  ;;  %v4329_v36 = vld [vmem:[#allocation2 + $0x554] ss:$24 sps:$4 sm:$0xff]   ;;  %v4332_v41 = vld [vmem:[#allocation2 + $0x224] ss:$24 sps:$4 sm:$0xff]   ;;  %v4342_v58 = vld [vmem:[#allocation2 + $0x1c0] ss:$24 sps:$4 sm:$0xff]  }
 0x128   :  { %2891 = vmatprep.subr.bf16.mxu1 %v4281_v42  ;;  %2866 = vmatprep.mubr.bf16.mxu0 %v4564_v53  ;;  %v4296_v53 = vld [vmem:[#allocation2 + $0x44] ss:$24 sps:$4 sm:$0xff]   ;;  %v2523_v0 = vpop.f32.mrf.mxu1  ;;  %v4345_v59 = vld [vmem:[#allocation2 + $0x4c0] ss:$24 sps:$4 sm:$0xff]  }
 0x129   :  { %2917 = vmatprep.mubr.bf16.mxu1 %v4566_v54  ;;  %v4299_v54 = vld [vmem:[#allocation2 + $0x344] ss:$24 sps:$4 sm:$0xff]   ;;  %v4680_v1 = vadd.f32 %v2523_v0, %v2472_v63  ;;  %v2474_v2 = vpop.f32.mrf.mxu0 }
 0x12a   :  { %2841 = vmatpush1.bf16.msra.mxu0 %v4276_v46  ;;  %v2525_v3 = vpop.f32.mrf.mxu1  ;;  %v4335_v42 = vld [vmem:[#allocation2 + $0x524] ss:$24 sps:$4 sm:$0xff]   ;;  %v4330_v46 = vld [vmem:[#allocation2 + $0x220] ss:$24 sps:$4 sm:$0xff]  }
 0x12b   :  { %2892 = vmatpush1.bf16.msra.mxu1 %v4279_v47  ;;  %2842 = vmatprep.subr.bf16.mxu0 %v4284_v50  ;;  %v2475_v10 = vpop.f32.mrf.mxu0  ;;  %v4333_v47 = vld [vmem:[#allocation2 + $0x520] ss:$24 sps:$4 sm:$0xff]   ;;  %v4338_v50 = vld [vmem:[#allocation2 + $0x1f4] ss:$24 sps:$4 sm:$0xff]   ;;  %v4356_v63 = vld [vmem:[#allocation2 + $0x764] ss:$24 sps:$4 sm:$0xff]  }
 0x12c   :  { %2893 = vmatprep.subr.bf16.mxu1 %v4287_v51  ;;  %v2526_v11 = vpop.f32.mrf.mxu1  ;;  %v4341_v51 = vld [vmem:[#allocation2 + $0x4f4] ss:$24 sps:$4 sm:$0xff]   ;;  %v4359_v0 = vld [vmem:[#allocation2 + $0xa64] ss:$24 sps:$4 sm:$0xff]   ;;  %v4354_v2 = vld [vmem:[#allocation2 + $0x760] ss:$24 sps:$4 sm:$0xff]  }
 0x12d   :  { %v4357_v3 = vld [vmem:[#allocation2 + $0xa60] ss:$24 sps:$4 sm:$0xff]   ;;  %v4360_v11 = vld [vmem:[#allocation2 + $0x730] ss:$24 sps:$4 sm:$0xff]  }
 0x12e   :  { %2843 = vmatpush1.bf16.msra.mxu0 %v4282_v52  ;;  %v4336_v52 = vld [vmem:[#allocation2 + $0x1f0] ss:$24 sps:$4 sm:$0xff]  }
 0x12f   :  { %2894 = vmatpush1.bf16.msra.mxu1 %v4285_v55  ;;  %2844 = vmatprep.subr.bf16.mxu0 %v4290_v56  ;;  %v4339_v55 = vld [vmem:[#allocation2 + $0x4f0] ss:$24 sps:$4 sm:$0xff]   ;;  %v4344_v56 = vld [vmem:[#allocation2 + $0x1c4] ss:$24 sps:$4 sm:$0xff]  }
 0x130   :  { %2895 = vmatprep.subr.bf16.mxu1 %v4293_v57  ;;  %v4347_v57 = vld [vmem:[#allocation2 + $0x4c4] ss:$24 sps:$4 sm:$0xff]  }
 0x132   :  { %2845 = vmatpush1.bf16.msra.mxu0 %v4288_v60  ;;  %v4350_v60 = vld [vmem:[#allocation2 + $0x194] ss:$24 sps:$4 sm:$0xff]  }
 0x133   :  { %2896 = vmatpush1.bf16.msra.mxu1 %v4291_v61  ;;  %2846 = vmatprep.subr.bf16.mxu0 %v4296_v53  ;;  %v4353_v61 = vld [vmem:[#allocation2 + $0x494] ss:$24 sps:$4 sm:$0xff]   ;;  %v4348_v53 = vld [vmem:[#allocation2 + $0x190] ss:$24 sps:$4 sm:$0xff]  }
 0x134   :  { %2897 = vmatprep.subr.bf16.mxu1 %v4299_v54  ;;  %v4351_v54 = vld [vmem:[#allocation2 + $0x490] ss:$24 sps:$4 sm:$0xff]  }
 0x136   :  { %2847 = vmatpush1.bf16.msra.mxu0 %v4294_v4  ;;  %v4362_v4 = vld [vmem:[#allocation2 + $0x734] ss:$24 sps:$4 sm:$0xff]  }
 0x137   :  { %2898 = vmatpush1.bf16.msra.mxu1 %v4297_v5  ;;  %2848 = vmatprep.subr.bf16.mxu0 %v4302_v6  ;;  %v4365_v5 = vld [vmem:[#allocation2 + $0xa34] ss:$24 sps:$4 sm:$0xff]  }
 0x138   :  { %2899 = vmatprep.subr.bf16.mxu1 %v4305_v7 }
 0x13a   :  { %2849 = vmatpush1.bf16.msra.mxu0 %v4300_v12  ;;  %v4363_v12 = vld [vmem:[#allocation2 + $0xa30] ss:$24 sps:$4 sm:$0xff]  }
 0x13b   :  { %2900 = vmatpush1.bf16.msra.mxu1 %v4303_v13  ;;  %2850 = vmatprep.subr.bf16.mxu0 %v4308_v14 }
 0x13c   :  { %2901 = vmatprep.subr.bf16.mxu1 %v4311_v15  ;;  %v4368_v15 = vld [vmem:[#allocation2 + $0x704] ss:$24 sps:$4 sm:$0xff]  }
 0x13e   :  { %2851 = vmatpush2.bf16.msra.mxu0 %v4306_v16  ;;  %v4371_v16 = vld [vmem:[#allocation2 + $0xa04] ss:$24 sps:$4 sm:$0xff]  }
 0x13f   :  { %2902 = vmatpush2.bf16.msra.mxu1 %v4309_v17  ;;  %2852 = vmatprep.subr.bf16.mxu0 %v4314_v19 }
 0x140   :  { %2903 = vmatprep.subr.bf16.mxu1 %v4317_v20 }
 0x142   :  { %2853 = vmatpush2.bf16.msra.mxu0 %v4312_v21  ;;  %v4366_v21 = vld [vmem:[#allocation2 + $0x700] ss:$24 sps:$4 sm:$0xff]  }
 0x143   :  { %2904 = vmatpush2.bf16.msra.mxu1 %v4315_v22  ;;  %2854 = vmatprep.subr.bf16.mxu0 %v4320_v23  ;;  %v4369_v22 = vld [vmem:[#allocation2 + $0xa00] ss:$24 sps:$4 sm:$0xff]  }
 0x144   :  { %2905 = vmatprep.subr.bf16.mxu1 %v4323_v24 }
 0x146   :  { %2855 = vmatpush2.bf16.msra.mxu0 %v4318_v26  ;;  %v4374_v26 = vld [vmem:[#allocation2 + $0x6d4] ss:$24 sps:$4 sm:$0xff]  }
 0x147   :  { %2906 = vmatpush2.bf16.msra.mxu1 %v4321_v29  ;;  %2856 = vmatprep.subr.bf16.mxu0 %v4326_v35 }
 0x148   :  { %2907 = vmatprep.subr.bf16.mxu1 %v4329_v36 }
 0x14a   :  { %2857 = vmatpush2.bf16.msra.mxu0 %v4324_v37  ;;  %v4372_v37 = vld [vmem:[#allocation2 + $0x6d0] ss:$24 sps:$4 sm:$0xff]  }
 0x14b   :  { %2908 = vmatpush2.bf16.msra.mxu1 %v4327_v40  ;;  %2858 = vmatprep.subr.bf16.mxu0 %v4332_v41  ;;  %v4375_v40 = vld [vmem:[#allocation2 + $0x9d0] ss:$24 sps:$4 sm:$0xff]  }
 0x14c   :  { %2909 = vmatprep.subr.bf16.mxu1 %v4335_v42 }
 0x14e   :  { %2859 = vmatpush2.bf16.msra.mxu0 %v4330_v46  ;;  %v4380_v46 = vld [vmem:[#allocation2 + $0x6a4] ss:$24 sps:$4 sm:$0xff]  }
 0x14f   :  { %2910 = vmatpush2.bf16.msra.mxu1 %v4333_v47  ;;  %2860 = vmatprep.subr.bf16.mxu0 %v4338_v50 }
 0x150   :  { %2911 = vmatprep.subr.bf16.mxu1 %v4341_v51  ;;  %v4378_v51 = vld [vmem:[#allocation2 + $0x6a0] ss:$24 sps:$4 sm:$0xff]  }
 0x152   :  { %2861 = vmatpush2.bf16.msra.mxu0 %v4336_v52  ;;  %v4381_v52 = vld [vmem:[#allocation2 + $0x9a0] ss:$24 sps:$4 sm:$0xff]  }
 0x153   :  { %2912 = vmatpush2.bf16.msra.mxu1 %v4339_v55  ;;  %2862 = vmatprep.subr.bf16.mxu0 %v4344_v56  ;;  %v4386_v55 = vld [vmem:[#allocation2 + $0x674] ss:$24 sps:$4 sm:$0xff]  }
 0x154   :  { %2913 = vmatprep.subr.bf16.mxu1 %v4347_v57  ;;  %v4389_v56 = vld [vmem:[#allocation2 + $0x974] ss:$24 sps:$4 sm:$0xff]  }
 0x156   :  { %2863 = vmatpush2.bf16.msra.mxu0 %v4342_v58  ;;  %v4384_v58 = vld [vmem:[#allocation2 + $0x670] ss:$24 sps:$4 sm:$0xff]  }
 0x157   :  { %2914 = vmatpush2.bf16.msra.mxu1 %v4345_v59  ;;  %2864 = vmatprep.subr.bf16.mxu0 %v4350_v60  ;;  %v4395_v59 = vld [vmem:[#allocation2 + $0x944] ss:$24 sps:$4 sm:$0xff]   ;;  %v4390_v60 = vld [vmem:[#allocation2 + $0x640] ss:$24 sps:$4 sm:$0xff]  }
 0x158   :  { %2915 = vmatprep.subr.bf16.mxu1 %v4353_v61  ;;  %v4393_v61 = vld [vmem:[#allocation2 + $0x940] ss:$24 sps:$4 sm:$0xff]  }
 0x15a   :  { %2865 = vmatpush2.bf16.msra.mxu0 %v4348_v53  ;;  %v4398_v53 = vld [vmem:[#allocation2 + $0x614] ss:$24 sps:$4 sm:$0xff]  }
 0x15b   :  { %2916 = vmatpush2.bf16.msra.mxu1 %v4351_v54  ;;  %2936 = vmatprep.subr.bf16.mxu0 %v4356_v63  ;;  %v4401_v54 = vld [vmem:[#allocation2 + $0x914] ss:$24 sps:$4 sm:$0xff]   ;;  %v4396_v63 = vld [vmem:[#allocation2 + $0x610] ss:$24 sps:$4 sm:$0xff]  }
 0x15c   :  { %2987 = vmatprep.subr.bf16.mxu1 %v4359_v0  ;;  %v4399_v0 = vld [vmem:[#allocation2 + $0x910] ss:$24 sps:$4 sm:$0xff]  }
 0x15d   :  { %v2562_v6 = vpop.f32.mrf.mxu0  ;;  %2867 = vmatmul.mubr.bf16.vlgmr.msra.gmra.mxu0 %v4570_v8 }
 0x15e   :  { %v2613_v7 = vpop.f32.mrf.mxu1  ;;  %2918 = vmatmul.mubr.bf16.vlgmr.msra.gmra.mxu1 %v4572_v9  ;;  %v2563_v10 = vadd.f32 %v2562_v6, %v4664_v18  ;;  %2937 = vmatpush1.bf16.msra.mxu0 %v4354_v2  ;;  %v4404_v2 = vld [vmem:[#allocation2 + $0x8e4] ss:$24 sps:$4 sm:$0xff]   ;;  %v4410_v6 = vld [vmem:[#allocation2 + $0x8b4] ss:$24 sps:$4 sm:$0xff]  }
 0x15f   :  { %2988 = vmatpush1.bf16.msra.mxu1 %v4357_v3  ;;  %v2564_v13 = vpop.f32.mrf.mxu0  ;;  %2938 = vmatprep.subr.bf16.mxu0 %v4362_v4  ;;  %v4407_v3 = vld [vmem:[#allocation2 + $0xbe4] ss:$24 sps:$4 sm:$0xff]   ;;  %v4402_v4 = vld [vmem:[#allocation2 + $0x8e0] ss:$24 sps:$4 sm:$0xff]  }
 0x160   :  { %v2615_v14 = vpop.f32.mrf.mxu1  ;;  %2989 = vmatprep.subr.bf16.mxu1 %v4365_v5  ;;  %v4685_v17 = vadd.f32 %v2613_v7, %v2563_v10  ;;  %v2565_v19 = vadd.f32 %v2564_v13, %v4666_v25  ;;  %2876 = vmatprep.mubr.bf16.mxu0 %v4579_v27  ;;  %v4377_v25 = vld [vmem:[#allocation2 + $0x9d4] ss:$24 sps:$4 sm:$0xff]   ;;  %v4405_v5 = vld [vmem:[#allocation2 + $0xbe0] ss:$24 sps:$4 sm:$0xff]   ;;  %v4408_v10 = vld [vmem:[#allocation2 + $0x8b0] ss:$24 sps:$4 sm:$0xff]  }
 0x161   :  { %2927 = vmatprep.mubr.bf16.mxu1 %v4586_v32  ;;  %v2566_v8 = vpop.f32.mrf.mxu0  ;;  %v4413_v7 = vld [vmem:[#allocation2 + $0xbb4] ss:$24 sps:$4 sm:$0xff]   ;;  %v4419_v13 = vld [vmem:[#allocation2 + $0xb84] ss:$24 sps:$4 sm:$0xff]  }
 0x162   :  { %v2617_v9 = vpop.f32.mrf.mxu1  ;;  %v4690_v18 = vadd.f32 %v2615_v14, %v2565_v19  ;;  %v2567_v20 = vadd.f32 %v2566_v8, %v4670_v34  ;;  %2939 = vmatpush1.bf16.msra.mxu0 %v4360_v11  ;;  %v4411_v11 = vld [vmem:[#allocation2 + $0xbb0] ss:$24 sps:$4 sm:$0xff]   ;;  %v4414_v14 = vld [vmem:[#allocation2 + $0x880] ss:$24 sps:$4 sm:$0xff]   ;;  %v4425_v19 = vld [vmem:[#allocation2 + $0xb54] ss:$24 sps:$4 sm:$0xff]  }
 0x163   :  { %2990 = vmatpush1.bf16.msra.mxu1 %v4363_v12  ;;  %v2568_v23 = vpop.f32.mrf.mxu0  ;;  %2940 = vmatprep.subr.bf16.mxu0 %v4368_v15  ;;  %v4416_v12 = vld [vmem:[#allocation2 + $0x884] ss:$24 sps:$4 sm:$0xff]   ;;  %v4417_v15 = vld [vmem:[#allocation2 + $0xb80] ss:$24 sps:$4 sm:$0xff]   ;;  %v4420_v8 = vld [vmem:[#allocation2 + $0x850] ss:$24 sps:$4 sm:$0xff]  }
 0x164   :  { %v2619_v24 = vpop.f32.mrf.mxu1  ;;  %2991 = vmatprep.subr.bf16.mxu1 %v4371_v16  ;;  %v4693_v29 = vadd.f32 %v2617_v9, %v2567_v20  ;;  %v2569_v27 = vadd.f32 %v2568_v23, %v4672_v43  ;;  %v4383_v43 = vld [vmem:[#allocation2 + $0x9a4] ss:$24 sps:$4 sm:$0xff]   ;;  %v4422_v16 = vld [vmem:[#allocation2 + $0x854] ss:$24 sps:$4 sm:$0xff]   ;;  %v4423_v9 = vld [vmem:[#allocation2 + $0xb50] ss:$24 sps:$4 sm:$0xff]  }
 0x165   :  { %v2572_v32 = vpop.f32.mrf.mxu0  ;;  %2877 = vmatmul.mubr.bf16.gmra.mxu0 %v4581_v28  ;;  %v4428_v20 = vld [vmem:[#allocation2 + $0x824] ss:$24 sps:$4 sm:$0xff]   ;;  %v4429_v23 = vld [vmem:[#allocation2 + $0xb20] ss:$24 sps:$4 sm:$0xff]  }
 0x166   :  { %v2623_v35 = vpop.f32.mrf.mxu1  ;;  %2928 = vmatmul.mubr.bf16.gmra.mxu1 %v4588_v33  ;;  %v4698_v34 = vadd.f32 %v2619_v24, %v2569_v27  ;;  %v2573_v36 = vadd.f32 %v2572_v32, %v4678_v62  ;;  %2941 = vmatpush1.bf16.msra.mxu0 %v4366_v21  ;;  %v4431_v21 = vld [vmem:[#allocation2 + $0xb24] ss:$24 sps:$4 sm:$0xff]   ;;  %v4434_v24 = vld [vmem:[#allocation2 + $0x7f4] ss:$24 sps:$4 sm:$0xff]   ;;  %v4435_v27 = vld [vmem:[#allocation2 + $0xaf0] ss:$24 sps:$4 sm:$0xff]  }
 0x167   :  { %2992 = vmatpush1.bf16.msra.mxu1 %v4369_v22  ;;  %v2574_v41 = vpop.f32.mrf.mxu0  ;;  %2942 = vmatprep.subr.bf16.mxu0 %v4374_v26  ;;  %v4426_v22 = vld [vmem:[#allocation2 + $0x820] ss:$24 sps:$4 sm:$0xff]   ;;  %v4437_v26 = vld [vmem:[#allocation2 + $0xaf4] ss:$24 sps:$4 sm:$0xff]   ;;  %v4440_v32 = vld [vmem:[#allocation2 + $0x7c4] ss:$24 sps:$4 sm:$0xff]  }
 0x168   :  { %v2625_v42 = vpop.f32.mrf.mxu1  ;;  %2993 = vmatprep.subr.bf16.mxu1 %v4377_v25  ;;  %v2575_v47 = vadd.f32 %v2574_v41, %v4680_v1  ;;  %v4702_v50 = vadd.f32 %v2623_v35, %v2573_v36  ;;  %2968 = vmatprep.mubr.bf16.mxu0 %v4606_v44  ;;  %v4387_v44 = vld [vmem:[#allocation2 + $0x970] ss:$24 sps:$4 sm:$0xff]   ;;  %v4443_v35 = vld [vmem:[#allocation2 + $0xac4] ss:$24 sps:$4 sm:$0xff]   ;;  %v4438_v36 = vld [vmem:[#allocation2 + $0x7c0] ss:$24 sps:$4 sm:$0xff]  }
 0x169   :  { %3019 = vmatprep.mubr.bf16.mxu1 %v4620_v49  ;;  %v2576_v28 = vpop.f32.mrf.mxu0  ;;  %v4392_v49 = vld [vmem:[#allocation2 + $0x644] ss:$24 sps:$4 sm:$0xff]   ;;  %v4432_v25 = vld [vmem:[#allocation2 + $0x7f0] ss:$24 sps:$4 sm:$0xff]   ;;  %v4449_v41 = vld [vmem:[#allocation2 + $0xa94] ss:$24 sps:$4 sm:$0xff]  }
 0x16a   :  { %v2627_v33 = vpop.f32.mrf.mxu1  ;;  %v4706_v62 = vadd.f32 %v2625_v42, %v2575_v47  ;;  %2943 = vmatpush1.bf16.msra.mxu0 %v4372_v37  ;;  %v4441_v37 = vld [vmem:[#allocation2 + $0xac0] ss:$24 sps:$4 sm:$0xff]   ;;  %v4444_v42 = vld [vmem:[#allocation2 + $0x790] ss:$24 sps:$4 sm:$0xff]  }
 0x16b   :  { %2994 = vmatpush1.bf16.msra.mxu1 %v4375_v40  ;;  %2944 = vmatprep.subr.bf16.mxu0 %v4380_v46  ;;  %v2577_v57 = vpop.f32.mrf.mxu0  ;;  %v4446_v40 = vld [vmem:[#allocation2 + $0x794] ss:$24 sps:$4 sm:$0xff]   ;;  %v4447_v46 = vld [vmem:[#allocation2 + $0xa90] ss:$24 sps:$4 sm:$0xff]  }
 0x16c   :  { %2995 = vmatprep.subr.bf16.mxu1 %v4383_v43  ;;  %v2628_v1 = vpop.f32.mrf.mxu1 }
 0x16e   :  { %2945 = vmatpush1.bf16.msra.mxu0 %v4378_v51 }
 0x16f   :  { %2996 = vmatpush1.bf16.msra.mxu1 %v4381_v52  ;;  %2946 = vmatprep.subr.bf16.mxu0 %v4386_v55 }
 0x170   :  { %2997 = vmatprep.subr.bf16.mxu1 %v4389_v56 }
 0x172   :  { %2947 = vmatpush1.bf16.msra.mxu0 %v4384_v58 }
 0x173   :  { %2998 = vmatpush1.bf16.msra.mxu1 %v4387_v44  ;;  %2948 = vmatprep.subr.bf16.mxu0 %v4392_v49 }
 0x174   :  { %2999 = vmatprep.subr.bf16.mxu1 %v4395_v59 }
 0x176   :  { %2949 = vmatpush1.bf16.msra.mxu0 %v4390_v60 }
 0x177   :  { %3000 = vmatpush1.bf16.msra.mxu1 %v4393_v61  ;;  %2950 = vmatprep.subr.bf16.mxu0 %v4398_v53 }
 0x178   :  { %3001 = vmatprep.subr.bf16.mxu1 %v4401_v54 }
 0x17a   :  { %2951 = vmatpush1.bf16.msra.mxu0 %v4396_v63  ;;  %v3159_v63 = vld [vmem:[#allocation4 + $0xf8] sm:$0xff] }
 0x17b   :  { %3002 = vmatpush1.bf16.msra.mxu1 %v4399_v0  ;;  %2952 = vmatprep.subr.bf16.mxu0 %v4404_v2  ;;  %v3143_v0 = vld [vmem:[#allocation4 + $0x78] sm:$0xff]  ;;  %v3158_v2 = vld [vmem:[#allocation4 + $0xf0] sm:$0xff] }
 0x17c   :  { %3003 = vmatprep.subr.bf16.mxu1 %v4407_v3  ;;  %v4524_v3 = vmov 0.0  }
 0x17e   :  { %2953 = vmatpush2.bf16.msra.mxu0 %v4402_v4  ;;  %v3157_v4 = vld [vmem:[#allocation4 + $0xe8] sm:$0xff] }
 0x17f   :  { %3004 = vmatpush2.bf16.msra.mxu1 %v4405_v5  ;;  %2954 = vmatprep.subr.bf16.mxu0 %v4410_v6  ;;  %v3174_v5 = vld [vmem:[#allocation4 + $0x170] sm:$0xff] }
 0x180   :  { %3005 = vmatprep.subr.bf16.mxu1 %v4413_v7 }
 0x182   :  { %2955 = vmatpush2.bf16.msra.mxu0 %v4408_v10  ;;  %v3141_v10 = vld [vmem:[#allocation4 + $0x68] sm:$0xff] }
 0x183   :  { %3006 = vmatpush2.bf16.msra.mxu1 %v4411_v11  ;;  %2956 = vmatprep.subr.bf16.mxu0 %v4416_v12  ;;  %v3156_v12 = vld [vmem:[#allocation4 + $0xe0] sm:$0xff] }
 0x184   :  { %3007 = vmatprep.subr.bf16.mxu1 %v4419_v13  ;;  %v3173_v13 = vld [vmem:[#allocation4 + $0x168] sm:$0xff] }
 0x186   :  { %2957 = vmatpush2.bf16.msra.mxu0 %v4414_v14 }
 0x187   :  { %3008 = vmatpush2.bf16.msra.mxu1 %v4417_v15  ;;  %2958 = vmatprep.subr.bf16.mxu0 %v4422_v16  ;;  %v3140_v16 = vld [vmem:[#allocation4 + $0x60] sm:$0xff] }
 0x188   :  { %3009 = vmatprep.subr.bf16.mxu1 %v4425_v19 }
 0x18a   :  { %2959 = vmatpush2.bf16.msra.mxu0 %v4420_v8 }
 0x18b   :  { %3010 = vmatpush2.bf16.msra.mxu1 %v4423_v9  ;;  %2960 = vmatprep.subr.bf16.mxu0 %v4428_v20  ;;  %v3155_v9 = vld [vmem:[#allocation4 + $0xd8] sm:$0xff]  ;;  %v3172_v20 = vld [vmem:[#allocation4 + $0x160] sm:$0xff] }
 0x18c   :  { %3011 = vmatprep.subr.bf16.mxu1 %v4431_v21 }
 0x18e   :  { %2961 = vmatpush2.bf16.msra.mxu0 %v4426_v22 }
 0x18f   :  { %3012 = vmatpush2.bf16.msra.mxu1 %v4429_v23  ;;  %2962 = vmatprep.subr.bf16.mxu0 %v4434_v24  ;;  %v3139_v23 = vld [vmem:[#allocation4 + $0x58] sm:$0xff] }
 0x190   :  { %3013 = vmatprep.subr.bf16.mxu1 %v4437_v26 }
 0x192   :  { %2963 = vmatpush2.bf16.msra.mxu0 %v4432_v25  ;;  %v3154_v25 = vld [vmem:[#allocation4 + $0xd0] sm:$0xff] }
 0x193   :  { %3014 = vmatpush2.bf16.msra.mxu1 %v4435_v27  ;;  %2964 = vmatprep.subr.bf16.mxu0 %v4440_v32  ;;  %v3171_v27 = vld [vmem:[#allocation4 + $0x158] sm:$0xff]  ;;  %v3038_v32 = vmul.f32 %v4685_v17, %v4685_v17 }
 0x194   :  { %3015 = vmatprep.subr.bf16.mxu1 %v4443_v35 }
 0x196   :  { %2965 = vmatpush2.bf16.msra.mxu0 %v4438_v36 }
 0x197   :  { %3016 = vmatpush2.bf16.msra.mxu1 %v4441_v37  ;;  %2966 = vmatprep.subr.bf16.mxu0 %v4446_v40  ;;  %v3138_v37 = vld [vmem:[#allocation4 + $0x50] sm:$0xff] }
 0x198   :  { %3017 = vmatprep.subr.bf16.mxu1 %v4449_v41 }
 0x19a   :  { %2967 = vmatpush2.bf16.msra.mxu0 %v4444_v42 }
 0x19b   :  { %3018 = vmatpush2.bf16.msra.mxu1 %v4447_v46  ;;  %3757 = vmatprep.subr.mxu0 %v3159_v63 }
 0x19c   :  { %3817 = vmatprep.subr.mxu1 %v4524_v3 }
 0x19d   :  { %v2664_v43 = vpop.f32.mrf.mxu0  ;;  %2969 = vmatmul.mubr.bf16.vlgmr.msra.gmra.mxu0 %v4626_v30 }
 0x19e   :  { %v2715_v47 = vpop.f32.mrf.mxu1  ;;  %3020 = vmatmul.mubr.bf16.vlgmr.msra.gmra.mxu1 %v4630_v31  ;;  %2978 = vmatprep.mubr.bf16.mxu0 %v4638_v38 }
 0x19f   :  { %v2716_v28 = vadd.f32 %v2715_v47, %v2664_v43  ;;  %3029 = vmatprep.mubr.bf16.mxu1 %v4640_v39  ;;  %v2666_v33 = vpop.f32.mrf.mxu0  ;;  %3758 = vmatpush3.msra.mxu0 %v3143_v0  ;;  %v3153_v47 = vld [vmem:[#allocation4 + $0xc8] sm:$0xff]  ;;  %v3150_v0 = vld [vmem:[#allocation4 + $0xb0] sm:$0xff] }
 0x1a0   :  { %v2717_v51 = vpop.f32.mrf.mxu1  ;;  %3759 = vmatprep.subr.mxu0 %v3158_v2  ;;  %v3167_v2 = vld [vmem:[#allocation4 + $0x138] sm:$0xff] }
 0x1a1   :  { %v2718_v52 = vadd.f32 %v2717_v51, %v2666_v33  ;;  %v2668_v55 = vpop.f32.mrf.mxu0 }
 0x1a2   :  { %v2719_v56 = vpop.f32.mrf.mxu1 }
 0x1a3   :  { %v2720_v57 = vadd.f32 %v2719_v56, %v2668_v55  ;;  %v2670_v1 = vpop.f32.mrf.mxu0  ;;  %v3041_v55 = vmul.f32 %v4693_v29, %v4693_v29  ;;  %v3151_v29 = vld [vmem:[#allocation4 + $0xb8] sm:$0xff] }
 0x1a4   :  { %v2721_v58 = vpop.f32.mrf.mxu1 }
 0x1a5   :  { %v4712_v44 = vadd.f32 %v2721_v58, %v2670_v1  ;;  %2979 = vmatmul.mubr.bf16.gmra.mxu0 %v4646_v45  ;;  %v2674_v30 = vpop.f32.mrf.mxu0  ;;  %v3175_v45 = vld [vmem:[#allocation4 + $0x178] sm:$0xff]  ;;  %v3152_v1 = vld [vmem:[#allocation4 + $0xc0] sm:$0xff]  ;;  %v3169_v58 = vld [vmem:[#allocation4 + $0x148] sm:$0xff] }
 0x1a6   :  { %3030 = vmatmul.mubr.bf16.gmra.mxu1 %v4648_v48  ;;  %v2725_v31 = vpop.f32.mrf.mxu1  ;;  %v3142_v48 = vld [vmem:[#allocation4 + $0x70] sm:$0xff] }
 0x1a7   :  { %v4716_v49 = vadd.f32 %v2725_v31, %v2674_v30  ;;  %v2676_v38 = vpop.f32.mrf.mxu0  ;;  %3818 = vmatpush3.msra.mxu1 %v3175_v45  ;;  %3760 = vmatpush3.msra.mxu0 %v3142_v48  ;;  %v3044_v45 = vmul.f32 %v4702_v50, %v4702_v50  ;;  %v3132_v50 = vld [vmem:[#allocation4 + $0x20] sm:$0xff] }
 0x1a8   :  { %v2727_v39 = vpop.f32.mrf.mxu1  ;;  %3819 = vmatprep.subr.mxu1 %v4524_v3  ;;  %3761 = vmatprep.subr.mxu0 %v3157_v4  ;;  %v3134_v4 = vld [vmem:[#allocation4 + $0x30] sm:$0xff] }
 0x1a9   :  { %v4718_v59 = vadd.f32 %v2727_v39, %v2676_v38  ;;  %v2678_v60 = vpop.f32.mrf.mxu0  ;;  %3820 = vmatpush3.msra.mxu1 %v3174_v5  ;;  %3762 = vmatpush3.msra.mxu0 %v3141_v10  ;;  %v3149_v5 = vld [vmem:[#allocation4 + $0xa8] sm:$0xff] }
 0x1aa   :  { %v2729_v61 = vpop.f32.mrf.mxu1  ;;  %3821 = vmatprep.subr.mxu1 %v4524_v3  ;;  %3763 = vmatprep.subr.mxu0 %v3156_v12  ;;  %v3168_v60 = vld [vmem:[#allocation4 + $0x140] sm:$0xff]  ;;  %v3133_v10 = vld [vmem:[#allocation4 + $0x28] sm:$0xff] }
 0x1ab   :  { %v2679_v53 = vpop.f32.mrf.mxu0  ;;  %3822 = vmatpush3.msra.mxu1 %v3173_v13  ;;  %3764 = vmatpush3.msra.mxu0 %v3140_v16  ;;  %v3165_v12 = vld [vmem:[#allocation4 + $0x128] sm:$0xff]  ;;  %v3147_v13 = vld [vmem:[#allocation4 + $0x98] sm:$0xff]  ;;  %v3146_v16 = vld [vmem:[#allocation4 + $0x90] sm:$0xff] }
 0x1ac   :  { %v2730_v54 = vpop.f32.mrf.mxu1  ;;  %3823 = vmatprep.subr.mxu1 %v4524_v3  ;;  %3765 = vmatprep.subr.mxu0 %v3155_v9  ;;  %v3130_v9 = vld [vmem:[#allocation4 + $0x10] sm:$0xff] }
 0x1ad   :  { %3824 = vmatpush3.msra.mxu1 %v3172_v20  ;;  %3766 = vmatpush3.msra.mxu0 %v3139_v23  ;;  %v3135_v54 = vld [vmem:[#allocation4 + $0x38] sm:$0xff]  ;;  %v3145_v20 = vld [vmem:[#allocation4 + $0x88] sm:$0xff]  ;;  %v3144_v23 = vld [vmem:[#allocation4 + $0x80] sm:$0xff] }
 0x1ae   :  { %3825 = vmatprep.subr.mxu1 %v4524_v3  ;;  %3767 = vmatprep.subr.mxu0 %v3154_v25  ;;  %v3160_v25 = vld [vmem:[#allocation4 + $0x100] sm:$0xff] }
 0x1af   :  { %3826 = vmatpush3.msra.mxu1 %v3171_v27  ;;  %3768 = vmatpush3.msra.mxu0 %v3138_v37 }
 0x1b0   :  { %3827 = vmatprep.subr.mxu1 %v4524_v3  ;;  %3769 = vmatprep.subr.mxu0 %v3153_v47 }
 0x1b1   :  { %3849 = vmatprep.mubr.msk.f32.mxu1 %vm4525_vm0, %v4524_v3 }
 0x1dd   :  { %v2766_v6 = vpop.f32.mrf.mxu0 }
 0x1de   :  { %v2817_v7 = vpop.f32.mrf.mxu1  ;;  %v2767_v11 = vadd.f32 %v2766_v6, %v2716_v28  ;;  %v3170_v28 = vld [vmem:[#allocation4 + $0x150] sm:$0xff] }
 0x1df   :  { %v2768_v14 = vpop.f32.mrf.mxu0  ;;  %3828 = vmatpush3.msra.mxu1 %v3170_v28  ;;  %v3166_v6 = vld [vmem:[#allocation4 + $0x130] sm:$0xff] }
 0x1e0   :  { %v2819_v15 = vpop.f32.mrf.mxu1  ;;  %v4723_v19 = vadd.f32 %v2817_v7, %v2767_v11  ;;  %v2769_v8 = vadd.f32 %v2768_v14, %v2718_v52  ;;  %v3137_v52 = vld [vmem:[#allocation4 + $0x48] sm:$0xff]  ;;  %3829 = vmatprep.subr.mxu1 %v4524_v3  ;;  %v3148_v11 = vld [vmem:[#allocation4 + $0xa0] sm:$0xff] }
 0x1e1   :  { %v2770_v21 = vpop.f32.mrf.mxu0  ;;  %3770 = vmatpush3.msra.mxu0 %v3137_v52  ;;  %3830 = vmatpush3.msra.mxu1 %v3169_v58  ;;  %v3164_v14 = vld [vmem:[#allocation4 + $0x120] sm:$0xff] }
 0x1e2   :  { %v2821_v22 = vpop.f32.mrf.mxu1  ;;  %v2820_v24 = vadd.f32 %v2819_v15, %v2769_v8  ;;  %v2771_v26 = vadd.f32 %v2770_v21, %v2720_v57  ;;  %3771 = vmatprep.subr.mxu0 %v3152_v1  ;;  %3831 = vmatprep.subr.mxu1 %v4524_v3  ;;  %v3131_v15 = vld [vmem:[#allocation4 + $0x18] sm:$0xff]  ;;  %v3162_v21 = vld [vmem:[#allocation4 + $0x110] sm:$0xff] }
 0x1e3   :  { %v2772_v35 = vpop.f32.mrf.mxu0  ;;  %3832 = vmatpush3.msra.mxu1 %v3168_v60  ;;  %v3163_v8 = vld [vmem:[#allocation4 + $0x118] sm:$0xff] }
 0x1e4   :  { %v2823_v36 = vpop.f32.mrf.mxu1  ;;  %v3047_v40 = vmul.f32 %v2820_v24, %v2820_v24  ;;  %v4729_v41 = vadd.f32 %v2821_v22, %v2771_v26  ;;  %v2773_v42 = vadd.f32 %v2772_v35, %v4712_v44  ;;  %3833 = vmatprep.subr.mxu1 %v4524_v3  ;;  %v3129_v22 = vld [vmem:[#allocation4 + $0x8] sm:$0xff]  ;;  %v3128_v26 = vld [vmem:[#allocation4] sm:$0xff] }
 0x1e5   :  { %v2776_v46 = vpop.f32.mrf.mxu0  ;;  %3834 = vmatpush3.msra.mxu1 %v3167_v2  ;;  %v3161_v24 = vld [vmem:[#allocation4 + $0x108] sm:$0xff] }
 0x1e6   :  { %v2827_v43 = vpop.f32.mrf.mxu1  ;;  %v4733_v33 = vadd.f32 %v3047_v40, %v3038_v32  ;;  %v2824_v17 = vadd.f32 %v2823_v36, %v2773_v42  ;;  %v2777_v51 = vadd.f32 %v2776_v46, %v4716_v49  ;;  %v3136_v49 = vld [vmem:[#allocation4 + $0x40] sm:$0xff]  ;;  %3835 = vmatprep.subr.mxu1 %v4524_v3 }
 0x1e7   :  { %v2778_v56 = vpop.f32.mrf.mxu0  ;;  %3772 = vmatpush3.msra.mxu0 %v3136_v49  ;;  %3836 = vmatpush3.msra.mxu1 %v3166_v6 }
 0x1e8   :  { %v2829_v57 = vpop.f32.mrf.mxu1  ;;  %v3050_v44 = vmul.f32 %v2824_v17, %v2824_v17  ;;  %v2779_v30 = vadd.f32 %v2778_v56, %v4718_v59  ;;  %v4739_v31 = vadd.f32 %v2827_v43, %v2777_v51  ;;  %3773 = vmatprep.subr.mxu0 %v3151_v29  ;;  %3837 = vmatprep.subr.mxu1 %v4524_v3  ;;  %4450 = vrsqrt.f32 %v4733_v33 }
 0x1e9   :  { %v2780_v38 = vpop.f32.mrf.mxu0  ;;  %3774 = vmatpush3.msra.mxu0 %v3135_v54  ;;  %3838 = vmatpush3.msra.mxu1 %v3165_v12  ;;  %vm3067_vm1 = vcmp.eq.f32.partialorder %v4733_v33, inf  ;;  %vm3069_vm2 = vcmp.eq.f32.partialorder %v4733_v33, 0.0 }
 0x1ea   :  { %v2831_v39 = vpop.f32.mrf.mxu1  ;;  %v4742_v61 = vadd.f32 %v3050_v44, %v3041_v55  ;;  %v2830_v53 = vadd.f32 %v2829_v57, %v2779_v30  ;;  %3775 = vmatprep.subr.mxu0 %v3150_v0  ;;  %3839 = vmatprep.subr.mxu1 %v4524_v3 }
 0x1eb   :  { %v2781_v59 = vpop.f32.mrf.mxu0  ;;  %3776 = vmatpush3.msra.mxu0 %v3134_v4  ;;  %3840 = vmatpush3.msra.mxu1 %v3164_v14 }
 0x1ec   :  { %v2832_v63 = vpop.f32.mrf.mxu1  ;;  %v3053_v48 = vmul.f32 %v2830_v53, %v2830_v53  ;;  %3777 = vmatprep.subr.mxu0 %v3149_v5  ;;  %3841 = vmatprep.subr.mxu1 %v4524_v3  ;;  %v3039_v53 = vmul.f32 %v4690_v18, %v4690_v18  ;;  %v3042_v18 = vmul.f32 %v4698_v34, %v4698_v34  ;;  %4452 = vrsqrt.f32 %v4742_v61 }
 0x1ed   :  { %3778 = vmatpush3.msra.mxu0 %v3133_v10  ;;  %3842 = vmatpush3.msra.mxu1 %v3163_v8  ;;  %vm3088_vm5 = vcmp.eq.f32.partialorder %v4742_v61, inf  ;;  %vm3090_vm10 = vcmp.eq.f32.partialorder %v4742_v61, 0.0 }
 0x1ee   :  { %v4748_v7 = vadd.f32 %v3053_v48, %v3044_v45  ;;  %3779 = vmatprep.subr.mxu0 %v3148_v11  ;;  %3843 = vmatprep.subr.mxu1 %v4524_v3  ;;  %v3040_v48 = vmul.f32 %v4723_v19, %v4723_v19  ;;  %v3043_v19 = vmul.f32 %v4729_v41, %v4729_v41 }
 0x1ef   :  { %3780 = vmatpush3.msra.mxu0 %v3132_v50  ;;  %3844 = vmatpush3.msra.mxu1 %v3162_v21 }
 0x1f0   :  { %3781 = vmatprep.subr.mxu0 %v3147_v13  ;;  %3845 = vmatprep.subr.mxu1 %v4524_v3  ;;  %vm3109_vm13 = vcmp.eq.f32.partialorder %v4748_v7, inf }
 0x1f1   :  { %3782 = vmatpush3.msra.mxu0 %v3131_v15  ;;  %3846 = vmatpush3.msra.mxu1 %v3161_v24 }
 0x1f2   :  { %3783 = vmatprep.subr.mxu0 %v3146_v16  ;;  %3847 = vmatprep.subr.mxu1 %v4524_v3 }
 0x1f3   :  { %3784 = vmatpush3.msra.mxu0 %v3130_v9  ;;  %3848 = vmatpush3.msra.mxu1 %v3160_v25 }
 0x1f4   :  { %3785 = vmatprep.subr.mxu0 %v3145_v20 }
 0x1f5   :  { %3786 = vmatpush3.msra.mxu0 %v3129_v22 }
 0x1f6   :  { %3787 = vmatprep.subr.mxu0 %v3144_v23 }
 0x1f7   :  { %3788 = vmatpush3.msra.mxu0 %v3128_v26 }
 0x21d   :  { %v2868_v27 = vpop.f32.mrf.mxu0 }
 0x21e   :  { %v2919_v32 = vpop.f32.mrf.mxu1 }
 0x21f   :  { %v2870_v35 = vpop.f32.mrf.mxu0  ;;  %v2920_v57 = vadd.f32 %v2919_v32, %v2868_v27 }
 0x220   :  { %v2921_v36 = vpop.f32.mrf.mxu1 }
 0x221   :  { %v2872_v37 = vpop.f32.mrf.mxu0  ;;  %v2922_v44 = vadd.f32 %v2921_v36, %v2870_v35  ;;  %v3045_v36 = vmul.f32 %v4706_v62, %v4706_v62 }
 0x222   :  { %v2923_v40 = vpop.f32.mrf.mxu1 }
 0x223   :  { %v2874_v42 = vpop.f32.mrf.mxu0  ;;  %v2924_v39 = vadd.f32 %v2923_v40, %v2872_v37 }
 0x224   :  { %v2925_v46 = vpop.f32.mrf.mxu1 }
 0x225   :  { %v2878_v43 = vpop.f32.mrf.mxu0  ;;  %v2926_v63 = vadd.f32 %v2925_v46, %v2874_v42  ;;  %v3046_v42 = vmul.f32 %v4739_v31, %v4739_v31  ;;  %v3070_v31 = vand.u32 2147483648, %v4733_v33 }
 0x226   :  { %v2929_v47 = vpop.f32.mrf.mxu1 }
 0x227   :  { %v2880_v28 = vpop.f32.mrf.mxu0  ;;  %v2930_v50 = vadd.f32 %v2929_v47, %v2878_v43  ;;  %v4451_v47 = vpop.eup %4450 }
 0x228   :  { %v2931_v17 = vpop.f32.mrf.mxu1  ;;  %v3066_v62 = vmul.f32 %v4451_v47, %v4733_v33 }
 0x229   :  { %v2882_v51 = vpop.f32.mrf.mxu0  ;;  %v2932_v13 = vadd.f32 %v2931_v17, %v2880_v28  ;;  %v4453_v17 = vpop.eup %4452 }
 0x22a   :  { %v2933_v52 = vpop.f32.mrf.mxu1 }
 0x22b   :  { %v2883_v55 = vpop.f32.mrf.mxu0 }
 0x22c   :  { %v2934_v56 = vpop.f32.mrf.mxu1 }
 0x25d   :  { %v2970_v1 = vpop.f32.mrf.mxu0 }
 0x25e   :  { %v3021_v58 = vpop.f32.mrf.mxu1  ;;  %v2971_v30 = vadd.f32 %v2970_v1, %v2920_v57  ;;  %v3068_v57 = vsel %vm3067_vm1, %v4733_v33, %v3066_v62  ;;  %v3087_v1 = vmul.f32 %v4453_v17, %v4742_v61 }
 0x25f   :  { %v2972_v49 = vpop.f32.mrf.mxu0 }
 0x260   :  { %v3023_v38 = vpop.f32.mrf.mxu1  ;;  %v3022_v29 = vadd.f32 %v3021_v58, %v2971_v30  ;;  %v2973_v60 = vadd.f32 %v2972_v49, %v2922_v44 }
 0x261   :  { %v2974_v54 = vpop.f32.mrf.mxu0 }
 0x262   :  { %v3025_v59 = vpop.f32.mrf.mxu1  ;;  %v3048_v0 = vmul.f32 %v3022_v29, %v3022_v29  ;;  %v3024_v2 = vadd.f32 %v3023_v38, %v2973_v60  ;;  %v2975_v45 = vadd.f32 %v2974_v54, %v2924_v39  ;;  %v3091_v29 = vand.u32 2147483648, %v4742_v61 }
 0x263   :  { %v2976_v4 = vpop.f32.mrf.mxu0  ;;  %v3071_v60 = vsel %vm3069_vm2, %v3070_v31, %v3068_v57  ;;  %vm3111_vm2 = vcmp.eq.f32.partialorder %v4748_v7, 0.0 }
 0x264   :  { %v3027_v5 = vpop.f32.mrf.mxu1  ;;  %v3057_v6 = vadd.f32 %v3048_v0, %v3039_v53  ;;  %v3049_v10 = vmul.f32 %v3024_v2, %v3024_v2  ;;  %v3026_v11 = vadd.f32 %v3025_v59, %v2975_v45  ;;  %v2977_v12 = vadd.f32 %v2976_v4, %v2926_v63 }
 0x265   :  { %v2980_v14 = vpop.f32.mrf.mxu0  ;;  %v3089_v2 = vsel %vm3088_vm5, %v4742_v61, %v3087_v1  ;;  %v3112_v61 = vand.u32 2147483648, %v4748_v7 }
 0x266   :  { %v3031_v15 = vpop.f32.mrf.mxu1  ;;  %4454 = vrsqrt.f32 %v3057_v6  ;;  %v3058_v16 = vadd.f32 %v3049_v10, %v3040_v48  ;;  %v3051_v8 = vmul.f32 %v3026_v11, %v3026_v11  ;;  %v3028_v9 = vadd.f32 %v3027_v5, %v2977_v12 }
 0x267   :  { %v2981_v20 = vadd.f32 %v2980_v14, %v2930_v50  ;;  %v2982_v21 = vpop.f32.mrf.mxu0  ;;  %vm3074_vm3 = vcmp.eq.f32.partialorder %v3057_v6, inf  ;;  %v3077_v56 = vand.u32 2147483648, %v3057_v6  ;;  %vm3076_vm4 = vcmp.eq.f32.partialorder %v3057_v6, 0.0 }
 0x268   :  { %v3033_v22 = vpop.f32.mrf.mxu1  ;;  %4456 = vrsqrt.f32 %v3058_v16  ;;  %v3060_v23 = vadd.f32 %v3051_v8, %v3042_v18  ;;  %v3052_v24 = vmul.f32 %v3028_v9, %v3028_v9  ;;  %v2983_v34 = vadd.f32 %v2982_v21, %v2932_v13 }
 0x269   :  { %4458 = vrsqrt.f32 %v4748_v7  ;;  %v3032_v26 = vadd.f32 %v3031_v15, %v2981_v20  ;;  %v2984_v25 = vpop.f32.mrf.mxu0  ;;  %vm3081_vm6 = vcmp.eq.f32.partialorder %v3058_v16, inf  ;;  %v3084_v39 = vand.u32 2147483648, %v3058_v16 }
 0x26a   :  { %v3035_v27 = vpop.f32.mrf.mxu1  ;;  %4460 = vrsqrt.f32 %v3060_v23  ;;  %v4770_v32 = vadd.f32 %v3052_v24, %v3043_v19  ;;  %v3034_v35 = vadd.f32 %v3033_v22, %v2983_v34  ;;  %vm3083_vm7 = vcmp.eq.f32.partialorder %v3058_v16, 0.0 }
 0x26b   :  { %v3054_v41 = vmul.f32 %v3032_v26, %v3032_v26  ;;  %v2985_v37 = vpop.f32.mrf.mxu0  ;;  %vm3095_vm8 = vcmp.eq.f32.partialorder %v3060_v23, inf  ;;  %v3098_v0 = vand.u32 2147483648, %v3060_v23  ;;  %vm3097_vm9 = vcmp.eq.f32.partialorder %v3060_v23, 0.0 }
 0x26c   :  { %v3036_v40 = vpop.f32.mrf.mxu1  ;;  %4462 = vrsqrt.f32 %v4770_v32  ;;  %v3055_v46 = vmul.f32 %v3034_v35, %v3034_v35  ;;  %vm3102_vm11 = vcmp.eq.f32.partialorder %v4770_v32, inf  ;;  %v3105_v5 = vand.u32 2147483648, %v4770_v32 }
 0x26d   :  { %v4777_v43 = vadd.f32 %v3054_v41, %v3045_v36  ;;  %v3092_v10 = vsel %vm3090_vm10, %v3091_v29, %v3089_v2  ;;  %vm3104_vm12 = vcmp.eq.f32.partialorder %v4770_v32, 0.0 }
 0x26e   :  { %v4779_v28 = vadd.f32 %v3055_v46, %v3046_v42 }
 0x26f   :  { %4464 = vrsqrt.f32 %v4777_v43  ;;  %vm3116_vm14 = vcmp.eq.f32.partialorder %v4777_v43, inf  ;;  %v3119_v13 = vand.u32 2147483648, %v4777_v43  ;;  %vm3118_vm15 = vcmp.eq.f32.partialorder %v4777_v43, 0.0 }
 0x270   :  { %4466 = vrsqrt.f32 %v4779_v28  ;;  %vm3123_vm1 = vcmp.eq.f32.partialorder %v4779_v28, inf  ;;  %v3126_v8 = vand.u32 2147483648, %v4779_v28 }
 0x273   :  { %v4455_v51 = vpop.eup %4454 }
 0x274   :  { %v3073_v52 = vmul.f32 %v4455_v51, %v3057_v6 }
 0x275   :  { %v4457_v55 = vpop.eup %4456 }
 0x276   :  { %v4459_v58 = vpop.eup %4458  ;;  %v3075_v44 = vsel %vm3074_vm3, %v3057_v6, %v3073_v52  ;;  %v3080_v30 = vmul.f32 %v4457_v55, %v3058_v16  ;;  %vm3125_vm3 = vcmp.eq.f32.partialorder %v4779_v28, 0.0 }
 0x277   :  { %v4461_v49 = vpop.eup %4460  ;;  %v3078_v38 = vsel %vm3076_vm4, %v3077_v56, %v3075_v44  ;;  %v3108_v33 = vmul.f32 %v4459_v58, %v4748_v7 }
 0x278   :  { %3240 = vmatprep.mubr.f32.mxu0 %v3078_v38  ;;  %v3082_v53 = vsel %vm3081_vm6, %v3058_v16, %v3080_v30  ;;  %v3094_v54 = vmul.f32 %v4461_v49, %v3060_v23 }
 0x279   :  { %v4463_v59 = vpop.eup %4462  ;;  %3241 = vmatmul.mubr.f32.vlgmr.msra.gmra.mxu0 %v3071_v60  ;;  %v3085_v63 = vsel %vm3083_vm7, %v3084_v39, %v3082_v53  ;;  %v3110_v14 = vsel %vm3109_vm13, %v4748_v7, %v3108_v33 }
 0x27a   :  { %3850 = vmatmul.mubr.f32.vlgmr.msra.gmra.mxu1 %v3085_v63  ;;  %v3096_v45 = vsel %vm3095_vm8, %v3060_v23, %v3094_v54  ;;  %v3101_v48 = vmul.f32 %v4463_v59, %v4770_v32  ;;  %v3113_v20 = vsel %vm3111_vm2, %v3112_v61, %v3110_v14 }
 0x27b   :  { %v3099_v4 = vsel %vm3097_vm9, %v3098_v0, %v3096_v45  ;;  %3852 = vmatprep.mubr.msk.f32.mxu1 %vm4525_vm0, %v4524_v3 }
 0x27c   :  { %v4465_v6 = vpop.eup %4464  ;;  %3245 = vmatprep.mubr.f32.mxu0 %v3099_v4  ;;  %v3103_v11 = vsel %vm3102_vm11, %v4770_v32, %v3101_v48 }
 0x27d   :  { %v4467_v12 = vpop.eup %4466  ;;  %3246 = vmatmul.mubr.f32.gmra.mxu0 %v3092_v10  ;;  %v3106_v18 = vsel %vm3104_vm12, %v3105_v5, %v3103_v11  ;;  %v3115_v50 = vmul.f32 %v4465_v6, %v4777_v43 }
 0x27e   :  { %3853 = vmatmul.mubr.f32.gmra.mxu1 %v3106_v18  ;;  %v3122_v15 = vmul.f32 %v4467_v12, %v4779_v28 }
 0x27f   :  { %v3117_v16 = vsel %vm3116_vm14, %v4777_v43, %v3115_v50  ;;  %3855 = vmatprep.mubr.msk.f32.mxu1 %vm4525_vm0, %v4524_v3 }
 0x280   :  { %v3120_v9 = vsel %vm3118_vm15, %v3119_v13, %v3117_v16  ;;  %v3124_v19 = vsel %vm3123_vm1, %v4779_v28, %v3122_v15 }
 0x281   :  { %3250 = vmatprep.mubr.f32.mxu0 %v3120_v9  ;;  %v3127_v21 = vsel %vm3125_vm3, %v3126_v8, %v3124_v19 }
 0x282   :  { %3251 = vmatmul.mubr.f32.gmra.mxu0 %v3113_v20  ;;  %3856 = vmatmul.mubr.f32.gmra.mxu1 %v3127_v21 }
 0x339   :  { %v3789_v22 = vpop.f32.mrf.mxu0 }
 0x33a   :  { %v3322_v23 = vpop.f32.mrf.mxu1 }
 0x33b   :  { %v3790_v24 = vpop.f32.mrf.mxu0 }
 0x33c   :  { %v3791_v3 = vadd.f32 %v3790_v24, %v3789_v22  ;;  %v3851_v34 = vpop.f32.mrf.mxu1 }
 0x33d   :  { %v3792_v26 = vpop.f32.mrf.mxu0 }
 0x33e   :  { %v3323_v25 = vadd.f32 %v3791_v3, %v3322_v23  ;;  %v3327_v27 = vpop.f32.mrf.mxu1 }
 0x33f   :  { %v3793_v32 = vpop.f32.mrf.mxu0 }
 0x340   :  { %v3336_v35 = vmax.f32 %v3323_v25, 1e-10  ;;  %v3794_v7 = vadd.f32 %v3793_v32, %v3792_v26  ;;  %v3854_v36 = vpop.f32.mrf.mxu1 }
 0x342   :  { %4468 = vlog2.f32 %v3336_v35  ;;  %v3328_v41 = vadd.f32 %v3794_v7, %v3327_v27  ;;  %v3795_v37 = vpop.f32.mrf.mxu0  ;;  %v3332_v40 = vpop.f32.mrf.mxu1 }
 0x344   :  { %v3337_v42 = vmax.f32 %v3328_v41, 1e-10  ;;  %v3796_v46 = vpop.f32.mrf.mxu0  ;;  %v3857_v43 = vpop.f32.mrf.mxu1 }
 0x345   :  { %v3797_v47 = vadd.f32 %v3796_v46, %v3795_v37 }
 0x346   :  { %4470 = vlog2.f32 %v3337_v42 }
 0x347   :  { %v3333_v28 = vadd.f32 %v3797_v47, %v3332_v40 }
 0x349   :  { %v3338_v62 = vmax.f32 %v3333_v28, 1e-10 }
 0x34b   :  { %4472 = vlog2.f32 %v3338_v62 }
 0x34f   :  { %v4469_v17 = vpop.eup %4468 }
 0x350   :  { %v3340_v51 = vmul.f32 0.6931472, %v4469_v17 }
 0x352   :  { %v3345_v52 = vmul.f32 0.4342945, %v3340_v51 }
 0x353   :  { %v4471_v31 = vpop.eup %4470 }
 0x354   :  { %3348 = vst [vmem:[%s4833_s3] sm:$0xff] %v3345_v52  ;;  %v3342_v55 = vmul.f32 0.6931472, %v4471_v31 }
 0x356   :  { %v3346_v56 = vmul.f32 0.4342945, %v3342_v55 }
 0x358   :  { %v4473_v57 = vpop.eup %4472  ;;  %3349 = vst [vmem:[%s4833_s3 + $0x8] sm:$0xff] %v3346_v56 }
 0x359   :  { %v3344_v1 = vmul.f32 0.6931472, %v4473_v57 }
 0x35b   :  { %v3347_v58 = vmul.f32 0.4342945, %v3344_v1 }
 0x35d   :  { %3350 = vst [vmem:[%s4833_s3 + $0x10] sm:$0xff] %v3347_v58 }
 0x35e   :  { %3355 = vsyncpa [#allocation3], 1 }
 0x35f   :  { %3356 = vsyncpa [#allocation5], 1 }

</bundles_post_ra>
